<compile_context>
chip_gen: v5e
topology: v5e:2x2
jax: 0.10.0
libtpu: 0.0.40
codegen_flags: <defaults>
</compile_context>

<pallas_src>
import functools

import numpy as np
import jax
import jax.numpy as jnp
from jax.experimental import pallas as pl
from jax.experimental.pallas import tpu as pltpu


# ---------------------------------------------------------------------------
# Kernel: one full FuzzyMultiheadAttention layer (q-proj, fuzzy membership,
# rule softmax, value weighting, scramble + out_proj) for the whole batch.
# ---------------------------------------------------------------------------
def fuzzy_layer_kernel(x_ref, perm_ref, wq_ref, bq_ref, wv_ref, bv_ref,
                       keys_ref, invw_ref, mpool_ref, pexp_ref,
                       bd_ref, bo_ref, o_ref, *,
                       batch, seq, num_heads, head_dim, num_rules, scale):
    """Shapes (all f32):
      x_ref:    (N, E)        N = B*S tokens, features (h, d)
      perm_ref: (N, N)        row permutation: (b, s=q*H+i) -> (i, b, q)
      wq_ref:   (E, E)        query_proj weight, transposed
      bq_ref:   (1, E)
      wv_ref:   (E, E*R)      value_proj weight, transposed + rule-major column permutation
      bv_ref:   (1, E*R)
      keys_ref: (R, E)        rules_keys flattened per rule (feature order h, d)
      invw_ref: (R, E)        1 / rules_widths
      mpool_ref:(E, H)        per-head mean-pool (1/D on head blocks)
      pexp_ref: (H, E)        per-head broadcast (1 on head blocks)
      bd_ref:   (H, E, H*E)   block-diagonal out_proj weights (scramble folded in)
      bo_ref:   (1, E)
      o_ref:    (B, H, SH, E) output; row-major merge of (H, SH) reproduces the torch
                              transpose(1,2).contiguous().view(B, -1, E) ordering.
    """
    B, S, H, D, R = batch, seq, num_heads, head_dim, num_rules
    E = H * D
    N = B * S
    SH = S // H          # output rows contributed per head (per batch)
    BSH = B * SH

    # ---- fold the (b, s) -> (i, b, q) token permutation into one MXU push ----
    xp = jnp.dot(perm_ref[...], x_ref[...], preferred_element_type=jnp.float32)   # (N, E)

    # ---- query projection + scale + NormalizeLayer(0, 1) ----
    q = jnp.dot(xp, wq_ref[...], preferred_element_type=jnp.float32) + bq_ref[...]
    qn = (q * scale) * 2.0 - 1.0                                                   # (N, E)

    # ---- value projection + scale (rule-major column slabs) ----
    v = jnp.dot(xp, wv_ref[...], preferred_element_type=jnp.float32) + bv_ref[...]
    v = v * scale                                                                  # (N, E*R)

    keys = keys_ref[...]
    invw = invw_ref[...]

    # ---- fuzzy membership for all rules, batched into ONE MXU push ----
    # z[(r,t), h] = mean_d( -0.5 * (|qn - key_r| / width_r)^2 )
    sq_rules = []
    for r in range(R):
        prot = jnp.abs(qn - keys[r:r + 1, :]) * invw[r:r + 1, :]
        sq_rules.append(-0.5 * prot * prot)
    sq = jnp.concatenate(sq_rules, axis=0)                                         # (R*N, E)
    z = jnp.dot(sq, mpool_ref[...], preferred_element_type=jnp.float32)            # (R*N, H)

    # ---- softmax over rules (dropout = identity in eval mode) ----
    z_rules = [z[r * N:(r + 1) * N, :] for r in range(R)]
    zmax = z_rules[0]
    for r in range(1, R):
        zmax = jnp.maximum(zmax, z_rules[r])
    e_rules = [jnp.exp(zr - zmax) for zr in z_rules]
    denom = e_rules[0]
    for r in range(1, R):
        denom = denom + e_rules[r]
    inv_denom = pl.reciprocal(denom, approx=True)                                  # EUP slot
    attn = jnp.concatenate([er * inv_denom for er in e_rules], axis=0)             # (R*N, H)

    # ---- broadcast attn over head_dim with ONE MXU push, rule-weighted value sum ----
    attn_e = jnp.dot(attn, pexp_ref[...], preferred_element_type=jnp.float32)      # (R*N, E)
    out = attn_e[0:N, :] * v[:, 0:E]
    for r in range(1, R):
        out = out + attn_e[r * N:(r + 1) * N, :] * v[:, r * E:(r + 1) * E]         # (N, E)
    # out rows are in permuted (i, b, q) order; out[., h*D+d] = sum_r attn * value.

    # ---- fused scramble (transpose(1,2).view) + out_proj via block-diagonal weights ----
    # y2[(b,q), h*E+n] = sum_i sum_d out[(i,b,q), h*D+d] * Wo_t[i*D+d, n]
    y2 = jnp.dot(out[0:BSH, :], bd_ref[0, :, :], preferred_element_type=jnp.float32)
    for i in range(1, H):
        y2 = y2 + jnp.dot(out[i * BSH:(i + 1) * BSH, :], bd_ref[i, :, :],
                          preferred_element_type=jnp.float32)                      # (BSH, H*E)

    bo = bo_ref[...]                                                               # (1, E)
    for b in range(B):
        rows = y2[b * SH:(b + 1) * SH, :]                                          # (SH, H*E)
        for h in range(H):
            o_ref[b, h, :, :] = (rows[:, h * E:(h + 1) * E] + bo).astype(o_ref.dtype)


# ---------------------------------------------------------------------------
# Wrappers (layout plumbing only)
# ---------------------------------------------------------------------------
def fuzzy_mha_forward(x_att, p):
    """One FuzzyMultiheadAttention layer. x_att: (B, S, E) in this layer's orientation."""
    B, S, E = x_att.shape
    H, R, D = p['num_heads'], p['num_rules'], p['head_dim']
    assert S % H == 0, "scramble-as-matmul requires num_heads | seq_len"
    SH = S // H
    N = B * S
    scale = float(D) ** -0.5

    # host-side token permutation matrix: dst (i, b, q)  <-  src (b, s = q*H + i)
    dst = np.arange(N)
    i_idx = dst // (B * SH)
    rem = dst % (B * SH)
    b_idx = rem // SH
    q_idx = rem % SH
    src = b_idx * S + q_idx * H + i_idx
    perm = np.zeros((N, N), np.float32)
    perm[dst, src] = 1.0
    perm = jnp.asarray(perm)

    xf = x_att.reshape(N, E)   # contiguous row-major flatten (free)

    kernel = functools.partial(fuzzy_layer_kernel, batch=B, seq=S, num_heads=H,
                               head_dim=D, num_rules=R, scale=scale)

    def _spec(a):
        nd = a.ndim
        return pl.BlockSpec(a.shape, lambda i, nd=nd: (0,) * nd)

    args = (xf, perm, p['wq_t'], p['bq'], p['wv_t'], p['bv'],
            p['keys'], p['inv_widths'], p['mpool'], p['pexp'],
            p['bd'], p['bo'])

    out4 = pl.pallas_call(
        kernel,
        out_shape=jax.ShapeDtypeStruct((B, H, SH, E), x_att.dtype),
        grid=(1,),
        in_specs=[_spec(a) for a in args],
        out_specs=pl.BlockSpec((B, H, SH, E), lambda i: (0, 0, 0, 0)),
        compiler_params=pltpu.CompilerParams(dimension_semantics=("arbitrary",)),
    )(*args)

    # (B, H, SH, E) -> (B, S, E): pure leading-dim merge; reproduces torch's
    # transpose(1,2).contiguous().view(B, -1, H*D) row ordering exactly.
    return out4.reshape(B, S, E)


def fuzzy_dual_attention(x, layer_params, layer_sort):
    """FuzzyDualAttention.forward: x is [B, seq_len, embed_dim]."""
    for p, layer_type in zip(layer_params, layer_sort):
        if layer_type == 's':
            x = jnp.swapaxes(x, 1, 2)   # tiny XLA transpose; kernel works on x^T
        x = fuzzy_mha_forward(x, p)
        if layer_type == 's':
            x = jnp.swapaxes(x, 1, 2)
    return x


# ---------------------------------------------------------------------------
# Deterministic parameter construction (synthetic; no checkpoint load)
# ---------------------------------------------------------------------------
def init_layer_params(key, embed_dim, num_heads, num_rules, dtype=jnp.float32):
    E, H, R = embed_dim, num_heads, num_rules
    D = E // H
    ks = jax.random.split(key, 7)
    std = 0.02

    wq = jax.random.normal(ks[0], (E, E), dtype) * std           # torch Linear (out, in)
    bq = jax.random.normal(ks[1], (E,), dtype) * std
    wv = jax.random.normal(ks[2], (E * R, E), dtype) * std       # value_proj (E*R, E)
    bv = jax.random.normal(ks[3], (E * R,), dtype) * std
    wo = jax.random.normal(ks[4], (E, E), dtype) * std
    bo = jax.random.normal(ks[5], (E,), dtype) * std
    rules_keys = jax.random.normal(ks[6], (H, R, D), dtype) * 0.02   # num_rules != 2 init path
    rules_widths = jnp.ones((H, R, D), dtype)

    # value_proj column permutation: torch feature order (h d r) -> rule-major (r h d)
    op = np.arange(E * R)
    r_idx = op // E
    rem = op % E
    h_idx = rem // D
    d_idx = rem % D
    perm_cols = h_idx * (D * R) + d_idx * R + r_idx

    # per-head mean-pool (E, H) and per-head broadcast (H, E) matrices
    head_of_e = np.arange(E) // D
    onehot = (head_of_e[:, None] == np.arange(H)[None, :]).astype(np.float32)

    # block-diagonal out_proj weights implementing scramble + Linear:
    # bd[i, h*D+d, h*E+n] = Wo_t[i*D+d, n]
    wo_t = np.asarray(wo).T                                       # (E_in, E_out)
    bd = np.zeros((H, E, H * E), np.float32)
    for i in range(H):
        for h in range(H):
            bd[i, h * D:(h + 1) * D, h * E:(h + 1) * E] = wo_t[i * D:(i + 1) * D, :]

    return dict(
        wq_t=wq.T, bq=bq.reshape(1, E),
        wv_t=wv.T[:, perm_cols], bv=bv[perm_cols].reshape(1, E * R),
        bo=bo.reshape(1, E),
        keys=jnp.transpose(rules_keys, (1, 0, 2)).reshape(R, E),
        inv_widths=1.0 / jnp.transpose(rules_widths, (1, 0, 2)).reshape(R, E),
        mpool=jnp.asarray(onehot / float(D)),
        pexp=jnp.asarray(onehot.T),
        bd=jnp.asarray(bd),
        num_heads=H, num_rules=R, head_dim=D,
    )


# ---------------------------------------------------------------------------
if __name__ == "__main__":
    B, SEQ_LEN, EMBED_DIM, NUM_RULES = 2, 16, 32, 4
    layer_sort = ('s', 'e')

    def auto_num_heads(dim):
        h = 8
        while dim % h != 0:
            h -= 1
        return h

    key = jax.random.PRNGKey(0)
    kx, k0, k1 = jax.random.split(key, 3)
    x = jax.random.normal(kx, (B, SEQ_LEN, EMBED_DIM), jnp.float32)

    # layer 0 ('s'): fea_size = (embed_dim, seq_len) -> attention embed_dim = SEQ_LEN
    p0 = init_layer_params(k0, SEQ_LEN, auto_num_heads(SEQ_LEN), NUM_RULES)
    # layer 1 ('e'): fea_size = (seq_len, embed_dim) -> attention embed_dim = EMBED_DIM
    p1 = init_layer_params(k1, EMBED_DIM, auto_num_heads(EMBED_DIM), NUM_RULES)

    out = fuzzy_dual_attention(x, (p0, p1), layer_sort)
    out = jax.block_until_ready(out)
    assert out.shape == (B, SEQ_LEN, EMBED_DIM), out.shape
    assert bool(jnp.all(jnp.isfinite(out)))
    print("KERNEL_OK")
</pallas_src>

<mosaic_0001>
module attributes {stable_mosaic.version = 11 : i64} {
  func.func @fuzzy_layer_kernel(%arg0: i32, %arg1: memref<64x16xf32, #tpu.memory_space<vmem>>, %arg2: memref<64x64xf32, #tpu.memory_space<vmem>>, %arg3: memref<16x16xf32, #tpu.memory_space<vmem>>, %arg4: memref<1x16xf32, #tpu.memory_space<vmem>>, %arg5: memref<16x64xf32, #tpu.memory_space<vmem>>, %arg6: memref<1x64xf32, #tpu.memory_space<vmem>>, %arg7: memref<4x16xf32, #tpu.memory_space<vmem>>, %arg8: memref<4x16xf32, #tpu.memory_space<vmem>>, %arg9: memref<16x8xf32, #tpu.memory_space<vmem>>, %arg10: memref<8x16xf32, #tpu.memory_space<vmem>>, %arg11: memref<8x16x128xf32, #tpu.memory_space<vmem>>, %arg12: memref<1x16xf32, #tpu.memory_space<vmem>>, %arg13: memref<2x8x4x16xf32, #tpu.memory_space<vmem>>) attributes {dimension_semantics = [#tpu.dimension_semantics<arbitrary>], iteration_bounds = array<i64: 1>, scalar_prefetch = 0 : i64, scratch_operands = 0 : i64, tpu.core_type = #tpu.core_type<tc>, window_params = [{pipeline_mode = #tpu.pipeline_mode<synchronous>, transform_indices = @transform_0, window_bounds = array<i64: 64, 16>}, {pipeline_mode = #tpu.pipeline_mode<synchronous>, transform_indices = @transform_1, window_bounds = array<i64: 64, 64>}, {pipeline_mode = #tpu.pipeline_mode<synchronous>, transform_indices = @transform_2, window_bounds = array<i64: 16, 16>}, {pipeline_mode = #tpu.pipeline_mode<synchronous>, transform_indices = @transform_3, window_bounds = array<i64: 1, 16>}, {pipeline_mode = #tpu.pipeline_mode<synchronous>, transform_indices = @transform_4, window_bounds = array<i64: 16, 64>}, {pipeline_mode = #tpu.pipeline_mode<synchronous>, transform_indices = @transform_5, window_bounds = array<i64: 1, 64>}, {pipeline_mode = #tpu.pipeline_mode<synchronous>, transform_indices = @transform_6, window_bounds = array<i64: 4, 16>}, {pipeline_mode = #tpu.pipeline_mode<synchronous>, transform_indices = @transform_7, window_bounds = array<i64: 4, 16>}, {pipeline_mode = #tpu.pipeline_mode<synchronous>, transform_indices = @transform_8, window_bounds = array<i64: 16, 8>}, {pipeline_mode = #tpu.pipeline_mode<synchronous>, transform_indices = @transform_9, window_bounds = array<i64: 8, 16>}, {pipeline_mode = #tpu.pipeline_mode<synchronous>, transform_indices = @transform_10, window_bounds = array<i64: 8, 16, 128>}, {pipeline_mode = #tpu.pipeline_mode<synchronous>, transform_indices = @transform_11, window_bounds = array<i64: 1, 16>}, {pipeline_mode = #tpu.pipeline_mode<synchronous>, transform_indices = @transform_12, window_bounds = array<i64: 2, 8, 4, 16>}]} {
    %c0 = arith.constant 0 : index
    %c0_0 = arith.constant 0 : index
    %0 = vector.load %arg2[%c0, %c0_0] : memref<64x64xf32, #tpu.memory_space<vmem>>, vector<64x64xf32>
    %c0_1 = arith.constant 0 : index
    %c0_2 = arith.constant 0 : index
    %1 = vector.load %arg1[%c0_1, %c0_2] : memref<64x16xf32, #tpu.memory_space<vmem>>, vector<64x16xf32>
    %cst = arith.constant dense<0.000000e+00> : vector<64x16xf32>
    %2 = tpu.matmul %0, %1, %cst {dimension_numbers = #tpu.dot_dimension_numbers<[1], [0], [0], [1], [0, 0, 1, 1], [], []>} : vector<64x64xf32>, vector<64x16xf32>, vector<64x16xf32> -> vector<64x16xf32>
    %c0_3 = arith.constant 0 : index
    %c0_4 = arith.constant 0 : index
    %3 = vector.load %arg3[%c0_3, %c0_4] : memref<16x16xf32, #tpu.memory_space<vmem>>, vector<16x16xf32>
    %cst_5 = arith.constant dense<0.000000e+00> : vector<64x16xf32>
    %4 = tpu.matmul %2, %3, %cst_5 {dimension_numbers = #tpu.dot_dimension_numbers<[1], [0], [0], [1], [0, 0, 1, 1], [], []>} : vector<64x16xf32>, vector<16x16xf32>, vector<64x16xf32> -> vector<64x16xf32>
    %c0_6 = arith.constant 0 : index
    %c0_7 = arith.constant 0 : index
    %5 = vector.load %arg4[%c0_6, %c0_7] : memref<1x16xf32, #tpu.memory_space<vmem>>, vector<1x16xf32>
    %6 = vector.broadcast %5 : vector<1x16xf32> to vector<64x16xf32>
    %7 = arith.addf %4, %6 : vector<64x16xf32>
    %cst_8 = arith.constant 0.707106769 : f32
    %8 = vector.broadcast %cst_8 : f32 to vector<64x16xf32>
    %9 = arith.mulf %7, %8 : vector<64x16xf32>
    %cst_9 = arith.constant 2.000000e+00 : f32
    %10 = vector.broadcast %cst_9 : f32 to vector<64x16xf32>
    %11 = arith.mulf %9, %10 : vector<64x16xf32>
    %cst_10 = arith.constant 1.000000e+00 : f32
    %12 = vector.broadcast %cst_10 : f32 to vector<64x16xf32>
    %13 = arith.subf %11, %12 : vector<64x16xf32>
    %c0_11 = arith.constant 0 : index
    %c0_12 = arith.constant 0 : index
    %14 = vector.load %arg5[%c0_11, %c0_12] : memref<16x64xf32, #tpu.memory_space<vmem>>, vector<16x64xf32>
    %cst_13 = arith.constant dense<0.000000e+00> : vector<64x64xf32>
    %15 = tpu.matmul %2, %14, %cst_13 {dimension_numbers = #tpu.dot_dimension_numbers<[1], [0], [0], [1], [0, 0, 1, 1], [], []>} : vector<64x16xf32>, vector<16x64xf32>, vector<64x64xf32> -> vector<64x64xf32>
    %c0_14 = arith.constant 0 : index
    %c0_15 = arith.constant 0 : index
    %16 = vector.load %arg6[%c0_14, %c0_15] : memref<1x64xf32, #tpu.memory_space<vmem>>, vector<1x64xf32>
    %17 = vector.broadcast %16 : vector<1x64xf32> to vector<64x64xf32>
    %18 = arith.addf %15, %17 : vector<64x64xf32>
    %cst_16 = arith.constant 0.707106769 : f32
    %19 = vector.broadcast %cst_16 : f32 to vector<64x64xf32>
    %20 = arith.mulf %18, %19 : vector<64x64xf32>
    %c0_17 = arith.constant 0 : index
    %c0_18 = arith.constant 0 : index
    %21 = vector.load %arg7[%c0_17, %c0_18] : memref<4x16xf32, #tpu.memory_space<vmem>>, vector<4x16xf32>
    %c0_19 = arith.constant 0 : index
    %c0_20 = arith.constant 0 : index
    %22 = vector.load %arg8[%c0_19, %c0_20] : memref<4x16xf32, #tpu.memory_space<vmem>>, vector<4x16xf32>
    %23 = vector.extract_strided_slice %21 {offsets = [0, 0], sizes = [1, 16], strides = [1, 1]} : vector<4x16xf32> to vector<1x16xf32>
    %24 = vector.broadcast %23 : vector<1x16xf32> to vector<64x16xf32>
    %25 = arith.subf %13, %24 : vector<64x16xf32>
    %26 = math.absf %25 : vector<64x16xf32>
    %27 = vector.extract_strided_slice %22 {offsets = [0, 0], sizes = [1, 16], strides = [1, 1]} : vector<4x16xf32> to vector<1x16xf32>
    %28 = vector.broadcast %27 : vector<1x16xf32> to vector<64x16xf32>
    %29 = arith.mulf %26, %28 : vector<64x16xf32>
    %cst_21 = arith.constant -5.000000e-01 : f32
    %30 = vector.broadcast %cst_21 : f32 to vector<64x16xf32>
    %31 = arith.mulf %30, %29 : vector<64x16xf32>
    %32 = arith.mulf %31, %29 : vector<64x16xf32>
    %33 = vector.extract_strided_slice %21 {offsets = [1, 0], sizes = [1, 16], strides = [1, 1]} : vector<4x16xf32> to vector<1x16xf32>
    %34 = vector.broadcast %33 : vector<1x16xf32> to vector<64x16xf32>
    %35 = arith.subf %13, %34 : vector<64x16xf32>
    %36 = math.absf %35 : vector<64x16xf32>
    %37 = vector.extract_strided_slice %22 {offsets = [1, 0], sizes = [1, 16], strides = [1, 1]} : vector<4x16xf32> to vector<1x16xf32>
    %38 = vector.broadcast %37 : vector<1x16xf32> to vector<64x16xf32>
    %39 = arith.mulf %36, %38 : vector<64x16xf32>
    %cst_22 = arith.constant -5.000000e-01 : f32
    %40 = vector.broadcast %cst_22 : f32 to vector<64x16xf32>
    %41 = arith.mulf %40, %39 : vector<64x16xf32>
    %42 = arith.mulf %41, %39 : vector<64x16xf32>
    %43 = vector.extract_strided_slice %21 {offsets = [2, 0], sizes = [1, 16], strides = [1, 1]} : vector<4x16xf32> to vector<1x16xf32>
    %44 = vector.broadcast %43 : vector<1x16xf32> to vector<64x16xf32>
    %45 = arith.subf %13, %44 : vector<64x16xf32>
    %46 = math.absf %45 : vector<64x16xf32>
    %47 = vector.extract_strided_slice %22 {offsets = [2, 0], sizes = [1, 16], strides = [1, 1]} : vector<4x16xf32> to vector<1x16xf32>
    %48 = vector.broadcast %47 : vector<1x16xf32> to vector<64x16xf32>
    %49 = arith.mulf %46, %48 : vector<64x16xf32>
    %cst_23 = arith.constant -5.000000e-01 : f32
    %50 = vector.broadcast %cst_23 : f32 to vector<64x16xf32>
    %51 = arith.mulf %50, %49 : vector<64x16xf32>
    %52 = arith.mulf %51, %49 : vector<64x16xf32>
    %53 = vector.extract_strided_slice %21 {offsets = [3, 0], sizes = [1, 16], strides = [1, 1]} : vector<4x16xf32> to vector<1x16xf32>
    %54 = vector.broadcast %53 : vector<1x16xf32> to vector<64x16xf32>
    %55 = arith.subf %13, %54 : vector<64x16xf32>
    %56 = math.absf %55 : vector<64x16xf32>
    %57 = vector.extract_strided_slice %22 {offsets = [3, 0], sizes = [1, 16], strides = [1, 1]} : vector<4x16xf32> to vector<1x16xf32>
    %58 = vector.broadcast %57 : vector<1x16xf32> to vector<64x16xf32>
    %59 = arith.mulf %56, %58 : vector<64x16xf32>
    %cst_24 = arith.constant -5.000000e-01 : f32
    %60 = vector.broadcast %cst_24 : f32 to vector<64x16xf32>
    %61 = arith.mulf %60, %59 : vector<64x16xf32>
    %62 = arith.mulf %61, %59 : vector<64x16xf32>
    %63 = tpu.concatenate %32, %42, %52, %62 in 0 : vector<64x16xf32>, vector<64x16xf32>, vector<64x16xf32>, vector<64x16xf32> -> vector<256x16xf32>
    %c0_25 = arith.constant 0 : index
    %c0_26 = arith.constant 0 : index
    %64 = vector.load %arg9[%c0_25, %c0_26] : memref<16x8xf32, #tpu.memory_space<vmem>>, vector<16x8xf32>
    %cst_27 = arith.constant dense<0.000000e+00> : vector<256x8xf32>
    %65 = tpu.matmul %63, %64, %cst_27 {dimension_numbers = #tpu.dot_dimension_numbers<[1], [0], [0], [1], [0, 0, 1, 1], [], []>} : vector<256x16xf32>, vector<16x8xf32>, vector<256x8xf32> -> vector<256x8xf32>
    %66 = vector.extract_strided_slice %65 {offsets = [0, 0], sizes = [64, 8], strides = [1, 1]} : vector<256x8xf32> to vector<64x8xf32>
    %67 = vector.extract_strided_slice %65 {offsets = [64, 0], sizes = [64, 8], strides = [1, 1]} : vector<256x8xf32> to vector<64x8xf32>
    %68 = vector.extract_strided_slice %65 {offsets = [128, 0], sizes = [64, 8], strides = [1, 1]} : vector<256x8xf32> to vector<64x8xf32>
    %69 = vector.extract_strided_slice %65 {offsets = [192, 0], sizes = [64, 8], strides = [1, 1]} : vector<256x8xf32> to vector<64x8xf32>
    %70 = arith.maximumf %66, %67 : vector<64x8xf32>
    %71 = arith.maximumf %70, %68 : vector<64x8xf32>
    %72 = arith.maximumf %71, %69 : vector<64x8xf32>
    %73 = arith.subf %66, %72 : vector<64x8xf32>
    %74 = math.exp %73 : vector<64x8xf32>
    %75 = arith.subf %67, %72 : vector<64x8xf32>
    %76 = math.exp %75 : vector<64x8xf32>
    %77 = arith.subf %68, %72 : vector<64x8xf32>
    %78 = math.exp %77 : vector<64x8xf32>
    %79 = arith.subf %69, %72 : vector<64x8xf32>
    %80 = math.exp %79 : vector<64x8xf32>
    %81 = arith.addf %74, %76 : vector<64x8xf32>
    %82 = arith.addf %81, %78 : vector<64x8xf32>
    %83 = arith.addf %82, %80 : vector<64x8xf32>
    %84 = tpu.reciprocal %83 {approx = true} : vector<64x8xf32> -> vector<64x8xf32>
    %85 = arith.mulf %74, %84 : vector<64x8xf32>
    %86 = arith.mulf %76, %84 : vector<64x8xf32>
    %87 = arith.mulf %78, %84 : vector<64x8xf32>
    %88 = arith.mulf %80, %84 : vector<64x8xf32>
    %89 = tpu.concatenate %85, %86, %87, %88 in 0 : vector<64x8xf32>, vector<64x8xf32>, vector<64x8xf32>, vector<64x8xf32> -> vector<256x8xf32>
    %c0_28 = arith.constant 0 : index
    %c0_29 = arith.constant 0 : index
    %90 = vector.load %arg10[%c0_28, %c0_29] : memref<8x16xf32, #tpu.memory_space<vmem>>, vector<8x16xf32>
    %cst_30 = arith.constant dense<0.000000e+00> : vector<256x16xf32>
    %91 = tpu.matmul %89, %90, %cst_30 {dimension_numbers = #tpu.dot_dimension_numbers<[1], [0], [0], [1], [0, 0, 1, 1], [], []>} : vector<256x8xf32>, vector<8x16xf32>, vector<256x16xf32> -> vector<256x16xf32>
    %92 = vector.extract_strided_slice %91 {offsets = [0, 0], sizes = [64, 16], strides = [1, 1]} : vector<256x16xf32> to vector<64x16xf32>
    %93 = vector.extract_strided_slice %20 {offsets = [0, 0], sizes = [64, 16], strides = [1, 1]} : vector<64x64xf32> to vector<64x16xf32>
    %94 = arith.mulf %92, %93 : vector<64x16xf32>
    %95 = vector.extract_strided_slice %91 {offsets = [64, 0], sizes = [64, 16], strides = [1, 1]} : vector<256x16xf32> to vector<64x16xf32>
    %96 = vector.extract_strided_slice %20 {offsets = [0, 16], sizes = [64, 16], strides = [1, 1]} : vector<64x64xf32> to vector<64x16xf32>
    %97 = arith.mulf %95, %96 : vector<64x16xf32>
    %98 = arith.addf %94, %97 : vector<64x16xf32>
    %99 = vector.extract_strided_slice %91 {offsets = [128, 0], sizes = [64, 16], strides = [1, 1]} : vector<256x16xf32> to vector<64x16xf32>
    %100 = vector.extract_strided_slice %20 {offsets = [0, 32], sizes = [64, 16], strides = [1, 1]} : vector<64x64xf32> to vector<64x16xf32>
    %101 = arith.mulf %99, %100 : vector<64x16xf32>
    %102 = arith.addf %98, %101 : vector<64x16xf32>
    %103 = vector.extract_strided_slice %91 {offsets = [192, 0], sizes = [64, 16], strides = [1, 1]} : vector<256x16xf32> to vector<64x16xf32>
    %104 = vector.extract_strided_slice %20 {offsets = [0, 48], sizes = [64, 16], strides = [1, 1]} : vector<64x64xf32> to vector<64x16xf32>
    %105 = arith.mulf %103, %104 : vector<64x16xf32>
    %106 = arith.addf %102, %105 : vector<64x16xf32>
    %107 = vector.extract_strided_slice %106 {offsets = [0, 0], sizes = [8, 16], strides = [1, 1]} : vector<64x16xf32> to vector<8x16xf32>
    %c0_31 = arith.constant 0 : index
    %c0_32 = arith.constant 0 : index
    %c0_33 = arith.constant 0 : index
    %108 = vector.load %arg11[%c0_31, %c0_32, %c0_33] : memref<8x16x128xf32, #tpu.memory_space<vmem>>, vector<1x16x128xf32>
    %109 = vector.shape_cast %108 : vector<1x16x128xf32> to vector<16x128xf32>
    %cst_34 = arith.constant dense<0.000000e+00> : vector<8x128xf32>
    %110 = tpu.matmul %107, %109, %cst_34 {dimension_numbers = #tpu.dot_dimension_numbers<[1], [0], [0], [1], [0, 0, 1, 1], [], []>} : vector<8x16xf32>, vector<16x128xf32>, vector<8x128xf32> -> vector<8x128xf32>
    %111 = vector.extract_strided_slice %106 {offsets = [8, 0], sizes = [8, 16], strides = [1, 1]} : vector<64x16xf32> to vector<8x16xf32>
    %c1 = arith.constant 1 : index
    %c0_35 = arith.constant 0 : index
    %c0_36 = arith.constant 0 : index
    %112 = vector.load %arg11[%c1, %c0_35, %c0_36] : memref<8x16x128xf32, #tpu.memory_space<vmem>>, vector<1x16x128xf32>
    %113 = vector.shape_cast %112 : vector<1x16x128xf32> to vector<16x128xf32>
    %cst_37 = arith.constant dense<0.000000e+00> : vector<8x128xf32>
    %114 = tpu.matmul %111, %113, %cst_37 {dimension_numbers = #tpu.dot_dimension_numbers<[1], [0], [0], [1], [0, 0, 1, 1], [], []>} : vector<8x16xf32>, vector<16x128xf32>, vector<8x128xf32> -> vector<8x128xf32>
    %115 = arith.addf %110, %114 : vector<8x128xf32>
    %116 = vector.extract_strided_slice %106 {offsets = [16, 0], sizes = [8, 16], strides = [1, 1]} : vector<64x16xf32> to vector<8x16xf32>
    %c2 = arith.constant 2 : index
    %c0_38 = arith.constant 0 : index
    %c0_39 = arith.constant 0 : index
    %117 = vector.load %arg11[%c2, %c0_38, %c0_39] : memref<8x16x128xf32, #tpu.memory_space<vmem>>, vector<1x16x128xf32>
    %118 = vector.shape_cast %117 : vector<1x16x128xf32> to vector<16x128xf32>
    %cst_40 = arith.constant dense<0.000000e+00> : vector<8x128xf32>
    %119 = tpu.matmul %116, %118, %cst_40 {dimension_numbers = #tpu.dot_dimension_numbers<[1], [0], [0], [1], [0, 0, 1, 1], [], []>} : vector<8x16xf32>, vector<16x128xf32>, vector<8x128xf32> -> vector<8x128xf32>
    %120 = arith.addf %115, %119 : vector<8x128xf32>
    %121 = vector.extract_strided_slice %106 {offsets = [24, 0], sizes = [8, 16], strides = [1, 1]} : vector<64x16xf32> to vector<8x16xf32>
    %c3 = arith.constant 3 : index
    %c0_41 = arith.constant 0 : index
    %c0_42 = arith.constant 0 : index
    %122 = vector.load %arg11[%c3, %c0_41, %c0_42] : memref<8x16x128xf32, #tpu.memory_space<vmem>>, vector<1x16x128xf32>
    %123 = vector.shape_cast %122 : vector<1x16x128xf32> to vector<16x128xf32>
    %cst_43 = arith.constant dense<0.000000e+00> : vector<8x128xf32>
    %124 = tpu.matmul %121, %123, %cst_43 {dimension_numbers = #tpu.dot_dimension_numbers<[1], [0], [0], [1], [0, 0, 1, 1], [], []>} : vector<8x16xf32>, vector<16x128xf32>, vector<8x128xf32> -> vector<8x128xf32>
    %125 = arith.addf %120, %124 : vector<8x128xf32>
    %126 = vector.extract_strided_slice %106 {offsets = [32, 0], sizes = [8, 16], strides = [1, 1]} : vector<64x16xf32> to vector<8x16xf32>
    %c4 = arith.constant 4 : index
    %c0_44 = arith.constant 0 : index
    %c0_45 = arith.constant 0 : index
    %127 = vector.load %arg11[%c4, %c0_44, %c0_45] : memref<8x16x128xf32, #tpu.memory_space<vmem>>, vector<1x16x128xf32>
    %128 = vector.shape_cast %127 : vector<1x16x128xf32> to vector<16x128xf32>
    %cst_46 = arith.constant dense<0.000000e+00> : vector<8x128xf32>
    %129 = tpu.matmul %126, %128, %cst_46 {dimension_numbers = #tpu.dot_dimension_numbers<[1], [0], [0], [1], [0, 0, 1, 1], [], []>} : vector<8x16xf32>, vector<16x128xf32>, vector<8x128xf32> -> vector<8x128xf32>
    %130 = arith.addf %125, %129 : vector<8x128xf32>
    %131 = vector.extract_strided_slice %106 {offsets = [40, 0], sizes = [8, 16], strides = [1, 1]} : vector<64x16xf32> to vector<8x16xf32>
    %c5 = arith.constant 5 : index
    %c0_47 = arith.constant 0 : index
    %c0_48 = arith.constant 0 : index
    %132 = vector.load %arg11[%c5, %c0_47, %c0_48] : memref<8x16x128xf32, #tpu.memory_space<vmem>>, vector<1x16x128xf32>
    %133 = vector.shape_cast %132 : vector<1x16x128xf32> to vector<16x128xf32>
    %cst_49 = arith.constant dense<0.000000e+00> : vector<8x128xf32>
    %134 = tpu.matmul %131, %133, %cst_49 {dimension_numbers = #tpu.dot_dimension_numbers<[1], [0], [0], [1], [0, 0, 1, 1], [], []>} : vector<8x16xf32>, vector<16x128xf32>, vector<8x128xf32> -> vector<8x128xf32>
    %135 = arith.addf %130, %134 : vector<8x128xf32>
    %136 = vector.extract_strided_slice %106 {offsets = [48, 0], sizes = [8, 16], strides = [1, 1]} : vector<64x16xf32> to vector<8x16xf32>
    %c6 = arith.constant 6 : index
    %c0_50 = arith.constant 0 : index
    %c0_51 = arith.constant 0 : index
    %137 = vector.load %arg11[%c6, %c0_50, %c0_51] : memref<8x16x128xf32, #tpu.memory_space<vmem>>, vector<1x16x128xf32>
    %138 = vector.shape_cast %137 : vector<1x16x128xf32> to vector<16x128xf32>
    %cst_52 = arith.constant dense<0.000000e+00> : vector<8x128xf32>
    %139 = tpu.matmul %136, %138, %cst_52 {dimension_numbers = #tpu.dot_dimension_numbers<[1], [0], [0], [1], [0, 0, 1, 1], [], []>} : vector<8x16xf32>, vector<16x128xf32>, vector<8x128xf32> -> vector<8x128xf32>
    %140 = arith.addf %135, %139 : vector<8x128xf32>
    %141 = vector.extract_strided_slice %106 {offsets = [56, 0], sizes = [8, 16], strides = [1, 1]} : vector<64x16xf32> to vector<8x16xf32>
    %c7 = arith.constant 7 : index
    %c0_53 = arith.constant 0 : index
    %c0_54 = arith.constant 0 : index
    %142 = vector.load %arg11[%c7, %c0_53, %c0_54] : memref<8x16x128xf32, #tpu.memory_space<vmem>>, vector<1x16x128xf32>
    %143 = vector.shape_cast %142 : vector<1x16x128xf32> to vector<16x128xf32>
    %cst_55 = arith.constant dense<0.000000e+00> : vector<8x128xf32>
    %144 = tpu.matmul %141, %143, %cst_55 {dimension_numbers = #tpu.dot_dimension_numbers<[1], [0], [0], [1], [0, 0, 1, 1], [], []>} : vector<8x16xf32>, vector<16x128xf32>, vector<8x128xf32> -> vector<8x128xf32>
    %145 = arith.addf %140, %144 : vector<8x128xf32>
    %c0_56 = arith.constant 0 : index
    %c0_57 = arith.constant 0 : index
    %146 = vector.load %arg12[%c0_56, %c0_57] : memref<1x16xf32, #tpu.memory_space<vmem>>, vector<1x16xf32>
    %147 = vector.extract_strided_slice %145 {offsets = [0, 0], sizes = [4, 128], strides = [1, 1]} : vector<8x128xf32> to vector<4x128xf32>
    %148 = vector.extract_strided_slice %147 {offsets = [0, 0], sizes = [4, 16], strides = [1, 1]} : vector<4x128xf32> to vector<4x16xf32>
    %149 = vector.broadcast %146 : vector<1x16xf32> to vector<4x16xf32>
    %150 = arith.addf %148, %149 : vector<4x16xf32>
    %c0_58 = arith.constant 0 : index
    %c0_59 = arith.constant 0 : index
    %c0_60 = arith.constant 0 : index
    %c0_61 = arith.constant 0 : index
    %151 = vector.load %arg13[%c0_58, %c0_59, %c0_60, %c0_61] : memref<2x8x4x16xf32, #tpu.memory_space<vmem>>, vector<1x1x4x16xf32>
    %152 = vector.shape_cast %151 : vector<1x1x4x16xf32> to vector<4x16xf32>
    %153 = vector.shape_cast %150 : vector<4x16xf32> to vector<1x1x4x16xf32>
    tpu.vector_store %arg13[%c0_58, %c0_59, %c0_60, %c0_61], %153 {strides = array<i32>} : memref<2x8x4x16xf32, #tpu.memory_space<vmem>>, vector<1x1x4x16xf32>,
    %154 = vector.extract_strided_slice %147 {offsets = [0, 16], sizes = [4, 16], strides = [1, 1]} : vector<4x128xf32> to vector<4x16xf32>
    %155 = vector.broadcast %146 : vector<1x16xf32> to vector<4x16xf32>
    %156 = arith.addf %154, %155 : vector<4x16xf32>
    %c0_62 = arith.constant 0 : index
    %c1_63 = arith.constant 1 : index
    %c0_64 = arith.constant 0 : index
    %c0_65 = arith.constant 0 : index
    %157 = vector.load %arg13[%c0_62, %c1_63, %c0_64, %c0_65] : memref<2x8x4x16xf32, #tpu.memory_space<vmem>>, vector<1x1x4x16xf32>
    %158 = vector.shape_cast %157 : vector<1x1x4x16xf32> to vector<4x16xf32>
    %159 = vector.shape_cast %156 : vector<4x16xf32> to vector<1x1x4x16xf32>
    tpu.vector_store %arg13[%c0_62, %c1_63, %c0_64, %c0_65], %159 {strides = array<i32>} : memref<2x8x4x16xf32, #tpu.memory_space<vmem>>, vector<1x1x4x16xf32>,
    %160 = vector.extract_strided_slice %147 {offsets = [0, 32], sizes = [4, 16], strides = [1, 1]} : vector<4x128xf32> to vector<4x16xf32>
    %161 = vector.broadcast %146 : vector<1x16xf32> to vector<4x16xf32>
    %162 = arith.addf %160, %161 : vector<4x16xf32>
    %c0_66 = arith.constant 0 : index
    %c2_67 = arith.constant 2 : index
    %c0_68 = arith.constant 0 : index
    %c0_69 = arith.constant 0 : index
    %163 = vector.load %arg13[%c0_66, %c2_67, %c0_68, %c0_69] : memref<2x8x4x16xf32, #tpu.memory_space<vmem>>, vector<1x1x4x16xf32>
    %164 = vector.shape_cast %163 : vector<1x1x4x16xf32> to vector<4x16xf32>
    %165 = vector.shape_cast %162 : vector<4x16xf32> to vector<1x1x4x16xf32>
    tpu.vector_store %arg13[%c0_66, %c2_67, %c0_68, %c0_69], %165 {strides = array<i32>} : memref<2x8x4x16xf32, #tpu.memory_space<vmem>>, vector<1x1x4x16xf32>,
    %166 = vector.extract_strided_slice %147 {offsets = [0, 48], sizes = [4, 16], strides = [1, 1]} : vector<4x128xf32> to vector<4x16xf32>
    %167 = vector.broadcast %146 : vector<1x16xf32> to vector<4x16xf32>
    %168 = arith.addf %166, %167 : vector<4x16xf32>
    %c0_70 = arith.constant 0 : index
    %c3_71 = arith.constant 3 : index
    %c0_72 = arith.constant 0 : index
    %c0_73 = arith.constant 0 : index
    %169 = vector.load %arg13[%c0_70, %c3_71, %c0_72, %c0_73] : memref<2x8x4x16xf32, #tpu.memory_space<vmem>>, vector<1x1x4x16xf32>
    %170 = vector.shape_cast %169 : vector<1x1x4x16xf32> to vector<4x16xf32>
    %171 = vector.shape_cast %168 : vector<4x16xf32> to vector<1x1x4x16xf32>
    tpu.vector_store %arg13[%c0_70, %c3_71, %c0_72, %c0_73], %171 {strides = array<i32>} : memref<2x8x4x16xf32, #tpu.memory_space<vmem>>, vector<1x1x4x16xf32>,
    %172 = vector.extract_strided_slice %147 {offsets = [0, 64], sizes = [4, 16], strides = [1, 1]} : vector<4x128xf32> to vector<4x16xf32>
    %173 = vector.broadcast %146 : vector<1x16xf32> to vector<4x16xf32>
    %174 = arith.addf %172, %173 : vector<4x16xf32>
    %c0_74 = arith.constant 0 : index
    %c4_75 = arith.constant 4 : index
    %c0_76 = arith.constant 0 : index
    %c0_77 = arith.constant 0 : index
    %175 = vector.load %arg13[%c0_74, %c4_75, %c0_76, %c0_77] : memref<2x8x4x16xf32, #tpu.memory_space<vmem>>, vector<1x1x4x16xf32>
    %176 = vector.shape_cast %175 : vector<1x1x4x16xf32> to vector<4x16xf32>
    %177 = vector.shape_cast %174 : vector<4x16xf32> to vector<1x1x4x16xf32>
    tpu.vector_store %arg13[%c0_74, %c4_75, %c0_76, %c0_77], %177 {strides = array<i32>} : memref<2x8x4x16xf32, #tpu.memory_space<vmem>>, vector<1x1x4x16xf32>,
    %178 = vector.extract_strided_slice %147 {offsets = [0, 80], sizes = [4, 16], strides = [1, 1]} : vector<4x128xf32> to vector<4x16xf32>
    %179 = vector.broadcast %146 : vector<1x16xf32> to vector<4x16xf32>
    %180 = arith.addf %178, %179 : vector<4x16xf32>
    %c0_78 = arith.constant 0 : index
    %c5_79 = arith.constant 5 : index
    %c0_80 = arith.constant 0 : index
    %c0_81 = arith.constant 0 : index
    %181 = vector.load %arg13[%c0_78, %c5_79, %c0_80, %c0_81] : memref<2x8x4x16xf32, #tpu.memory_space<vmem>>, vector<1x1x4x16xf32>
    %182 = vector.shape_cast %181 : vector<1x1x4x16xf32> to vector<4x16xf32>
    %183 = vector.shape_cast %180 : vector<4x16xf32> to vector<1x1x4x16xf32>
    tpu.vector_store %arg13[%c0_78, %c5_79, %c0_80, %c0_81], %183 {strides = array<i32>} : memref<2x8x4x16xf32, #tpu.memory_space<vmem>>, vector<1x1x4x16xf32>,
    %184 = vector.extract_strided_slice %147 {offsets = [0, 96], sizes = [4, 16], strides = [1, 1]} : vector<4x128xf32> to vector<4x16xf32>
    %185 = vector.broadcast %146 : vector<1x16xf32> to vector<4x16xf32>
    %186 = arith.addf %184, %185 : vector<4x16xf32>
    %c0_82 = arith.constant 0 : index
    %c6_83 = arith.constant 6 : index
    %c0_84 = arith.constant 0 : index
    %c0_85 = arith.constant 0 : index
    %187 = vector.load %arg13[%c0_82, %c6_83, %c0_84, %c0_85] : memref<2x8x4x16xf32, #tpu.memory_space<vmem>>, vector<1x1x4x16xf32>
    %188 = vector.shape_cast %187 : vector<1x1x4x16xf32> to vector<4x16xf32>
    %189 = vector.shape_cast %186 : vector<4x16xf32> to vector<1x1x4x16xf32>
    tpu.vector_store %arg13[%c0_82, %c6_83, %c0_84, %c0_85], %189 {strides = array<i32>} : memref<2x8x4x16xf32, #tpu.memory_space<vmem>>, vector<1x1x4x16xf32>,
    %190 = vector.extract_strided_slice %147 {offsets = [0, 112], sizes = [4, 16], strides = [1, 1]} : vector<4x128xf32> to vector<4x16xf32>
    %191 = vector.broadcast %146 : vector<1x16xf32> to vector<4x16xf32>
    %192 = arith.addf %190, %191 : vector<4x16xf32>
    %c0_86 = arith.constant 0 : index
    %c7_87 = arith.constant 7 : index
    %c0_88 = arith.constant 0 : index
    %c0_89 = arith.constant 0 : index
    %193 = vector.load %arg13[%c0_86, %c7_87, %c0_88, %c0_89] : memref<2x8x4x16xf32, #tpu.memory_space<vmem>>, vector<1x1x4x16xf32>
    %194 = vector.shape_cast %193 : vector<1x1x4x16xf32> to vector<4x16xf32>
    %195 = vector.shape_cast %192 : vector<4x16xf32> to vector<1x1x4x16xf32>
    tpu.vector_store %arg13[%c0_86, %c7_87, %c0_88, %c0_89], %195 {strides = array<i32>} : memref<2x8x4x16xf32, #tpu.memory_space<vmem>>, vector<1x1x4x16xf32>,
    %196 = vector.extract_strided_slice %145 {offsets = [4, 0], sizes = [4, 128], strides = [1, 1]} : vector<8x128xf32> to vector<4x128xf32>
    %197 = vector.extract_strided_slice %196 {offsets = [0, 0], sizes = [4, 16], strides = [1, 1]} : vector<4x128xf32> to vector<4x16xf32>
    %198 = vector.broadcast %146 : vector<1x16xf32> to vector<4x16xf32>
    %199 = arith.addf %197, %198 : vector<4x16xf32>
    %c1_90 = arith.constant 1 : index
    %c0_91 = arith.constant 0 : index
    %c0_92 = arith.constant 0 : index
    %c0_93 = arith.constant 0 : index
    %200 = vector.load %arg13[%c1_90, %c0_91, %c0_92, %c0_93] : memref<2x8x4x16xf32, #tpu.memory_space<vmem>>, vector<1x1x4x16xf32>
    %201 = vector.shape_cast %200 : vector<1x1x4x16xf32> to vector<4x16xf32>
    %202 = vector.shape_cast %199 : vector<4x16xf32> to vector<1x1x4x16xf32>
    tpu.vector_store %arg13[%c1_90, %c0_91, %c0_92, %c0_93], %202 {strides = array<i32>} : memref<2x8x4x16xf32, #tpu.memory_space<vmem>>, vector<1x1x4x16xf32>,
    %203 = vector.extract_strided_slice %196 {offsets = [0, 16], sizes = [4, 16], strides = [1, 1]} : vector<4x128xf32> to vector<4x16xf32>
    %204 = vector.broadcast %146 : vector<1x16xf32> to vector<4x16xf32>
    %205 = arith.addf %203, %204 : vector<4x16xf32>
    %c1_94 = arith.constant 1 : index
    %c1_95 = arith.constant 1 : index
    %c0_96 = arith.constant 0 : index
    %c0_97 = arith.constant 0 : index
    %206 = vector.load %arg13[%c1_94, %c1_95, %c0_96, %c0_97] : memref<2x8x4x16xf32, #tpu.memory_space<vmem>>, vector<1x1x4x16xf32>
    %207 = vector.shape_cast %206 : vector<1x1x4x16xf32> to vector<4x16xf32>
    %208 = vector.shape_cast %205 : vector<4x16xf32> to vector<1x1x4x16xf32>
    tpu.vector_store %arg13[%c1_94, %c1_95, %c0_96, %c0_97], %208 {strides = array<i32>} : memref<2x8x4x16xf32, #tpu.memory_space<vmem>>, vector<1x1x4x16xf32>,
    %209 = vector.extract_strided_slice %196 {offsets = [0, 32], sizes = [4, 16], strides = [1, 1]} : vector<4x128xf32> to vector<4x16xf32>
    %210 = vector.broadcast %146 : vector<1x16xf32> to vector<4x16xf32>
    %211 = arith.addf %209, %210 : vector<4x16xf32>
    %c1_98 = arith.constant 1 : index
    %c2_99 = arith.constant 2 : index
    %c0_100 = arith.constant 0 : index
    %c0_101 = arith.constant 0 : index
    %212 = vector.load %arg13[%c1_98, %c2_99, %c0_100, %c0_101] : memref<2x8x4x16xf32, #tpu.memory_space<vmem>>, vector<1x1x4x16xf32>
    %213 = vector.shape_cast %212 : vector<1x1x4x16xf32> to vector<4x16xf32>
    %214 = vector.shape_cast %211 : vector<4x16xf32> to vector<1x1x4x16xf32>
    tpu.vector_store %arg13[%c1_98, %c2_99, %c0_100, %c0_101], %214 {strides = array<i32>} : memref<2x8x4x16xf32, #tpu.memory_space<vmem>>, vector<1x1x4x16xf32>,
    %215 = vector.extract_strided_slice %196 {offsets = [0, 48], sizes = [4, 16], strides = [1, 1]} : vector<4x128xf32> to vector<4x16xf32>
    %216 = vector.broadcast %146 : vector<1x16xf32> to vector<4x16xf32>
    %217 = arith.addf %215, %216 : vector<4x16xf32>
    %c1_102 = arith.constant 1 : index
    %c3_103 = arith.constant 3 : index
    %c0_104 = arith.constant 0 : index
    %c0_105 = arith.constant 0 : index
    %218 = vector.load %arg13[%c1_102, %c3_103, %c0_104, %c0_105] : memref<2x8x4x16xf32, #tpu.memory_space<vmem>>, vector<1x1x4x16xf32>
    %219 = vector.shape_cast %218 : vector<1x1x4x16xf32> to vector<4x16xf32>
    %220 = vector.shape_cast %217 : vector<4x16xf32> to vector<1x1x4x16xf32>
    tpu.vector_store %arg13[%c1_102, %c3_103, %c0_104, %c0_105], %220 {strides = array<i32>} : memref<2x8x4x16xf32, #tpu.memory_space<vmem>>, vector<1x1x4x16xf32>,
    %221 = vector.extract_strided_slice %196 {offsets = [0, 64], sizes = [4, 16], strides = [1, 1]} : vector<4x128xf32> to vector<4x16xf32>
    %222 = vector.broadcast %146 : vector<1x16xf32> to vector<4x16xf32>
    %223 = arith.addf %221, %222 : vector<4x16xf32>
    %c1_106 = arith.constant 1 : index
    %c4_107 = arith.constant 4 : index
    %c0_108 = arith.constant 0 : index
    %c0_109 = arith.constant 0 : index
    %224 = vector.load %arg13[%c1_106, %c4_107, %c0_108, %c0_109] : memref<2x8x4x16xf32, #tpu.memory_space<vmem>>, vector<1x1x4x16xf32>
    %225 = vector.shape_cast %224 : vector<1x1x4x16xf32> to vector<4x16xf32>
    %226 = vector.shape_cast %223 : vector<4x16xf32> to vector<1x1x4x16xf32>
    tpu.vector_store %arg13[%c1_106, %c4_107, %c0_108, %c0_109], %226 {strides = array<i32>} : memref<2x8x4x16xf32, #tpu.memory_space<vmem>>, vector<1x1x4x16xf32>,
    %227 = vector.extract_strided_slice %196 {offsets = [0, 80], sizes = [4, 16], strides = [1, 1]} : vector<4x128xf32> to vector<4x16xf32>
    %228 = vector.broadcast %146 : vector<1x16xf32> to vector<4x16xf32>
    %229 = arith.addf %227, %228 : vector<4x16xf32>
    %c1_110 = arith.constant 1 : index
    %c5_111 = arith.constant 5 : index
    %c0_112 = arith.constant 0 : index
    %c0_113 = arith.constant 0 : index
    %230 = vector.load %arg13[%c1_110, %c5_111, %c0_112, %c0_113] : memref<2x8x4x16xf32, #tpu.memory_space<vmem>>, vector<1x1x4x16xf32>
    %231 = vector.shape_cast %230 : vector<1x1x4x16xf32> to vector<4x16xf32>
    %232 = vector.shape_cast %229 : vector<4x16xf32> to vector<1x1x4x16xf32>
    tpu.vector_store %arg13[%c1_110, %c5_111, %c0_112, %c0_113], %232 {strides = array<i32>} : memref<2x8x4x16xf32, #tpu.memory_space<vmem>>, vector<1x1x4x16xf32>,
    %233 = vector.extract_strided_slice %196 {offsets = [0, 96], sizes = [4, 16], strides = [1, 1]} : vector<4x128xf32> to vector<4x16xf32>
    %234 = vector.broadcast %146 : vector<1x16xf32> to vector<4x16xf32>
    %235 = arith.addf %233, %234 : vector<4x16xf32>
    %c1_114 = arith.constant 1 : index
    %c6_115 = arith.constant 6 : index
    %c0_116 = arith.constant 0 : index
    %c0_117 = arith.constant 0 : index
    %236 = vector.load %arg13[%c1_114, %c6_115, %c0_116, %c0_117] : memref<2x8x4x16xf32, #tpu.memory_space<vmem>>, vector<1x1x4x16xf32>
    %237 = vector.shape_cast %236 : vector<1x1x4x16xf32> to vector<4x16xf32>
    %238 = vector.shape_cast %235 : vector<4x16xf32> to vector<1x1x4x16xf32>
    tpu.vector_store %arg13[%c1_114, %c6_115, %c0_116, %c0_117], %238 {strides = array<i32>} : memref<2x8x4x16xf32, #tpu.memory_space<vmem>>, vector<1x1x4x16xf32>,
    %239 = vector.extract_strided_slice %196 {offsets = [0, 112], sizes = [4, 16], strides = [1, 1]} : vector<4x128xf32> to vector<4x16xf32>
    %240 = vector.broadcast %146 : vector<1x16xf32> to vector<4x16xf32>
    %241 = arith.addf %239, %240 : vector<4x16xf32>
    %c1_118 = arith.constant 1 : index
    %c7_119 = arith.constant 7 : index
    %c0_120 = arith.constant 0 : index
    %c0_121 = arith.constant 0 : index
    %242 = vector.load %arg13[%c1_118, %c7_119, %c0_120, %c0_121] : memref<2x8x4x16xf32, #tpu.memory_space<vmem>>, vector<1x1x4x16xf32>
    %243 = vector.shape_cast %242 : vector<1x1x4x16xf32> to vector<4x16xf32>
    %244 = vector.shape_cast %241 : vector<4x16xf32> to vector<1x1x4x16xf32>
    tpu.vector_store %arg13[%c1_118, %c7_119, %c0_120, %c0_121], %244 {strides = array<i32>} : memref<2x8x4x16xf32, #tpu.memory_space<vmem>>, vector<1x1x4x16xf32>,
    return
  }
  func.func @transform_0(%arg0: i32) -> (i32, i32) {
    %c0_i32 = arith.constant 0 : i32
    %c0_i32_0 = arith.constant 0 : i32
    %c0_i32_1 = arith.constant 0 : i32
    return %c0_i32, %c0_i32_0 : i32, i32
  }
  func.func @transform_1(%arg0: i32) -> (i32, i32) {
    %c0_i32 = arith.constant 0 : i32
    %c0_i32_0 = arith.constant 0 : i32
    %c0_i32_1 = arith.constant 0 : i32
    return %c0_i32, %c0_i32_0 : i32, i32
  }
  func.func @transform_2(%arg0: i32) -> (i32, i32) {
    %c0_i32 = arith.constant 0 : i32
    %c0_i32_0 = arith.constant 0 : i32
    %c0_i32_1 = arith.constant 0 : i32
    return %c0_i32, %c0_i32_0 : i32, i32
  }
  func.func @transform_3(%arg0: i32) -> (i32, i32) {
    %c0_i32 = arith.constant 0 : i32
    %c0_i32_0 = arith.constant 0 : i32
    %c0_i32_1 = arith.constant 0 : i32
    return %c0_i32, %c0_i32_0 : i32, i32
  }
  func.func @transform_4(%arg0: i32) -> (i32, i32) {
    %c0_i32 = arith.constant 0 : i32
    %c0_i32_0 = arith.constant 0 : i32
    %c0_i32_1 = arith.constant 0 : i32
    return %c0_i32, %c0_i32_0 : i32, i32
  }
  func.func @transform_5(%arg0: i32) -> (i32, i32) {
    %c0_i32 = arith.constant 0 : i32
    %c0_i32_0 = arith.constant 0 : i32
    %c0_i32_1 = arith.constant 0 : i32
    return %c0_i32, %c0_i32_0 : i32, i32
  }
  func.func @transform_6(%arg0: i32) -> (i32, i32) {
    %c0_i32 = arith.constant 0 : i32
    %c0_i32_0 = arith.constant 0 : i32
    %c0_i32_1 = arith.constant 0 : i32
    return %c0_i32, %c0_i32_0 : i32, i32
  }
  func.func @transform_7(%arg0: i32) -> (i32, i32) {
    %c0_i32 = arith.constant 0 : i32
    %c0_i32_0 = arith.constant 0 : i32
    %c0_i32_1 = arith.constant 0 : i32
    return %c0_i32, %c0_i32_0 : i32, i32
  }
  func.func @transform_8(%arg0: i32) -> (i32, i32) {
    %c0_i32 = arith.constant 0 : i32
    %c0_i32_0 = arith.constant 0 : i32
    %c0_i32_1 = arith.constant 0 : i32
    return %c0_i32, %c0_i32_0 : i32, i32
  }
  func.func @transform_9(%arg0: i32) -> (i32, i32) {
    %c0_i32 = arith.constant 0 : i32
    %c0_i32_0 = arith.constant 0 : i32
    %c0_i32_1 = arith.constant 0 : i32
    return %c0_i32, %c0_i32_0 : i32, i32
  }
  func.func @transform_10(%arg0: i32) -> (i32, i32, i32) {
    %c0_i32 = arith.constant 0 : i32
    %c0_i32_0 = arith.constant 0 : i32
    %c0_i32_1 = arith.constant 0 : i32
    %c0_i32_2 = arith.constant 0 : i32
    return %c0_i32, %c0_i32_0, %c0_i32_1 : i32, i32, i32
  }
  func.func @transform_11(%arg0: i32) -> (i32, i32) {
    %c0_i32 = arith.constant 0 : i32
    %c0_i32_0 = arith.constant 0 : i32
    %c0_i32_1 = arith.constant 0 : i32
    return %c0_i32, %c0_i32_0 : i32, i32
  }
  func.func @transform_12(%arg0: i32) -> (i32, i32, i32, i32) {
    %c0_i32 = arith.constant 0 : i32
    %c0_i32_0 = arith.constant 0 : i32
    %c0_i32_1 = arith.constant 0 : i32
    %c0_i32_2 = arith.constant 0 : i32
    %c0_i32_3 = arith.constant 0 : i32
    return %c0_i32, %c0_i32_0, %c0_i32_1, %c0_i32_2 : i32, i32, i32, i32
  }
}

</mosaic_0001>

<bundles_post_ra>
// kernel: tpu_custom_call.1
= control target key start
LH: loop header
LB: loop body
LE: loop exit
PB: predicated region body
PF: predicated region fallthrough
CT: control target
= control target key end

     0   :  { %17 = vsyncpa [#allocation3], 0  ;;  %s2618_s0 = inlined_call_operand.vmem [shape: f32[64,16], index: 0, kind: input, shape index: {}]   ;;  %s2619_s1 = inlined_call_operand.vmem [shape: f32[64,64], index: 1, kind: input, shape index: {}]   ;;  %s2620_s2 = inlined_call_operand.vmem [shape: f32[16,16], index: 2, kind: input, shape index: {}]   ;;  %s2621_s3 = inlined_call_operand.vmem [shape: f32[1,16], index: 3, kind: input, shape index: {}]   ;;  %s2622_s4 = inlined_call_operand.hbm [shape: f32[16,64], index: 4, kind: input, shape index: {}]   ;;  %s2623_s5 = inlined_call_operand.hbm [shape: f32[1,64], index: 5, kind: input, shape index: {}]   ;;  %s2624_s6 = inlined_call_operand.vmem [shape: f32[4,16], index: 6, kind: input, shape index: {}]   ;;  %s2625_s7 = inlined_call_operand.hbm [shape: f32[4,16], index: 7, kind: input, shape index: {}]   ;;  %s2626_s8 = inlined_call_operand.vmem [shape: f32[16,8], index: 8, kind: input, shape index: {}]   ;;  %s2627_s9 = inlined_call_operand.vmem [shape: f32[8,16], index: 9, kind: input, shape index: {}]   ;;  %s2628_s10 = inlined_call_operand.hbm [shape: f32[8,16,128], index: 10, kind: input, shape index: {}]   ;;  %s2629_s11 = inlined_call_operand.vmem [shape: f32[1,16], index: 11, kind: input, shape index: {}]   ;;  %s2630_s12 = inlined_call_operand.hbm [shape: f32[2,8,4,16], index: 12, kind: output, shape index: {}]  }
   0x1   :  { %18 = vsyncpa [#allocation6], 0 }
   0x2   :  { %19 = vsyncpa [#allocation9], 0  ;;  %s47_s23 = sshll.u32 %s2623_s5, 4  ;;  %s48_s23 = int_to_ptr.hbm [resolvable:$true] %s47_s23 }
   0x3   :  { %20 = vsyncpa [#allocation4], 0  ;;  %s1908_s24 = smov [#allocation5]   ;;  %s33_s28 = sshll.u32 %s2622_s4, 4  ;;  %s34_s28 = int_to_ptr.hbm [resolvable:$true] %s33_s28 }
   0x4   :  { %s49_s25 = sshll.u32 %s1908_s24, 4  ;;  %s1909_s29 = smov [#allocation2]   ;;  %s50_s25 = int_to_ptr.vmem [resolvable:$true] %s49_s25 }
   0x5   :  { %52 = dma.hbm_to_vmem [thread:$0]  %s48_s23, 16, %s50_s25, [#allocation6]  }
   0x6   :  { %s35_s30 = sshll.u32 %s1909_s29, 4  ;;  %s1910_s13 = smov 128   ;;  %s36_s30 = int_to_ptr.vmem [resolvable:$true] %s35_s30 }
   0x7   :  { %s1911_s14 = smov 8   ;;  %s60_s5 = sshll.u32 %s2625_s7, 4  ;;  %s61_s5 = int_to_ptr.hbm [resolvable:$true] %s60_s5 }
   0x8   :  { %41 = dma.hbm_to_vmem [thread:$0]  %s34_s28, 256, %s36_s30, [#allocation3], %s1910_s13, %s1910_s13, %s1911_s14  }
   0x9   :  { %s1912_s17 = smov [#allocation7]   ;;  %s74_s4 = sshll.u32 %s2628_s10, 4  ;;  %s75_s4 = int_to_ptr.hbm [resolvable:$true] %s74_s4 }
   0xa   :  { %s62_s18 = sshll.u32 %s1912_s17, 4  ;;  %s1913_s21 = smov [#allocation8]   ;;  %s63_s18 = int_to_ptr.vmem [resolvable:$true] %s62_s18 }
   0xb   :  { %65 = dma.hbm_to_vmem [thread:$0]  %s61_s5, 64, %s63_s18, [#allocation6]  }
   0xc   :  { %s76_s22 = sshll.u32 %s1913_s21, 4  ;;  %s77_s22 = int_to_ptr.vmem [resolvable:$true] %s76_s22 }
   0xd   :  { %82 = dma.hbm_to_vmem [thread:$0]  %s75_s4, 2048, %s77_s22, [#allocation9], %s1910_s13, %s1910_s13, %s1911_s14  }
   0xe   :  { %1900 = dma.done.wait [#allocation3], 256  }
   0xf   :  { %1901 = vsyncadd [#allocation3], 4294967040 }
  0x10   :  { %1902 = dma.done.wait [#allocation6], 80  }
  0x11   :  { %1903 = vsyncadd [#allocation6], 4294967216 }
  0x12   :  { %1904 = dma.done.wait [#allocation9], 2048  }
  0x13   :  { %1905 = vsyncadd [#allocation9], 4294965248  ;;  %v116_v0 = vld [vmem:[%s2618_s0 + $0x38] sm:$0xff]  ;;  %v115_v1 = vld [vmem:[%s2618_s0 + $0x30] sm:$0xff]  ;;  %vm117_vm0 = vcmask 523264   ;;  %vm189_vm1 = vcmask 130048  }
  0x14   :  { %150 = vmatpush.msra.mxu0 %v116_v0  ;;  %v114_v2 = vld [vmem:[%s2618_s0 + $0x28] sm:$0xff]  ;;  %v113_v3 = vld [vmem:[%s2618_s0 + $0x20] sm:$0xff]  ;;  %v112_v4 = vld [vmem:[%s2618_s0 + $0x18] sm:$0xff]  ;;  %vm900_vm2 = vcmask 64512   ;;  %s1918_s7 = smov 32   ;;  %s1919_s23 = smov 48  }
  0x15   :  { %v111_v5 = vld [vmem:[%s2618_s0 + $0x10] sm:$0xff]  ;;  %v110_v6 = vld [vmem:[%s2618_s0 + $0x8] sm:$0xff]  ;;  %v109_v7 = vld [vmem:[%s2618_s0] sm:$0xff]  ;;  %s1917_s0 = smov 16   ;;  %vm1464_vm3 = vcmask 125952   ;;  %vm1537_vm4 = vcmask 130052  }
  0x16   :  { %151 = vmatpush.msra.mxu0 %v115_v1  ;;  %v101_v8 = vld [vmem:[%s2619_s1] sm:$0xff]  ;;  %v102_v9 = vld [vmem:[%s2619_s1 + $0x8] sm:$0xff]  ;;  %v103_v10 = vld [vmem:[%s2619_s1 + $0x10] sm:$0xff]  ;;  %s1921_s24 = smov [#allocation10]   ;;  %s1559_s27 = sshll.u32 %s2630_s12, 4  ;;  %s1560_s27 = int_to_ptr.hbm [resolvable:$true] %s1559_s27 }
  0x17   :  { %v104_v11 = vld [vmem:[%s2619_s1 + $0x18] sm:$0xff]  ;;  %v184_v12 = vld [vmem:[%s2620_s2 + $0x8] sm:$0xff]  ;;  %v105_v14 = vld [vmem:[%s2619_s1 + $0x20] sm:$0xff]  ;;  %s1557_s25 = sshll.u32 %s1921_s24, 4  ;;  %s1922_s28 = smov 4   ;;  %s1558_s25 = int_to_ptr.vmem [resolvable:$true] %s1557_s25 }
  0x18   :  { %152 = vmatpush.msra.mxu0 %v114_v2  ;;  %v280_v13 = vld [vmem:[#allocation2 + $0x8] sm:$0xff]  ;;  %228 = vmatpush.msra.mxu1 %v184_v12  ;;  %v107_v16 = vld [vmem:[%s2619_s1 + $0x30] sm:$0xff]  ;;  %v108_v17 = vld [vmem:[%s2619_s1 + $0x38] sm:$0xff] }
  0x19   :  { %299 = vmatpush.msra.mxu2 %v280_v13  ;;  %v106_v15 = vld [vmem:[%s2619_s1 + $0x28] sm:$0xff]  ;;  %v183_v18 = vld [vmem:[%s2620_s2] sm:$0xff]  ;;  %v2093_v35 = vld [vmem:[#allocation5] ss:$0 sm:$0xff] }
  0x1a   :  { %153 = vmatpush.msra.mxu0 %v113_v3  ;;  %v279_v19 = vld [vmem:[#allocation2] sm:$0xff]  ;;  %229 = vmatpush.msra.mxu1 %v183_v18  ;;  %v505_v28 = vld [vmem:[%s2626_s8 + $0x8] sm:$0xff]  ;;  %v335_v38 = vld [vmem:[#allocation7] sm:$0xf] }
  0x1b   :  { %300 = vmatpush.msra.mxu2 %v279_v19  ;;  %1678 = vmatpush.msra.mxu3 %v505_v28  ;;  %v504_v29 = vld [vmem:[%s2626_s8] sm:$0xff]  ;;  %v2104_v46 = vperm.slane %v335_v38, 0  ;;  %v2106_v47 = vperm.slane %v335_v38, 1  ;;  %v2114_v53 = vperm.slane %v335_v38, 2  ;;  %v2117_v55 = vperm.slane %v335_v38, 3  ;;  %s1916_s8 = smov 80  }
  0x1c   :  { %154 = vmatpush.msra.mxu0 %v112_v4  ;;  %v2087_v30 = vld [vmem:[%s2621_s3] ss:$0 sm:$0xff]  ;;  %s1914_s3 = smov 96  }
  0x1d   :  { %616 = vmatpush.msrb.mxu2 %v505_v28  ;;  %1679 = vmatpush.msra.mxu3 %v504_v29  ;;  %v334_v33 = vld [vmem:[%s2624_s6] sm:$0xf]  ;;  %s1915_s6 = smov 112  }
  0x1e   :  { %155 = vmatpush.msra.mxu0 %v111_v5  ;;  %v2095_v37 = vperm.slane %v334_v33, 0  ;;  %v2097_v39 = vperm.slane %v334_v33, 1  ;;  %v2099_v41 = vperm.slane %v334_v33, 3  ;;  %v2101_v42 = vperm.slane %v334_v33, 2 }
  0x1f   :  { %617 = vmatpush.msrb.mxu2 %v504_v29 }
  0x20   :  { %156 = vmatpush.msra.mxu0 %v110_v6 }
  0x22   :  { %157 = vmatpush.msra.mxu0 %v109_v7 }
  0x23   :  { %1574 = vmatmul.msk.f32.vlgmr.msra.gmra.mxu0 %vm117_vm0, %v101_v8 }
  0x2b   :  { %1575 = vmatmul.msk.f32.gmra.mxu0 %vm117_vm0, %v102_v9 }
  0x33   :  { %1576 = vmatmul.msk.f32.gmra.mxu0 %vm117_vm0, %v103_v10 }
  0x3b   :  { %1577 = vmatmul.msk.f32.gmra.mxu0 %vm117_vm0, %v104_v11 }
  0x43   :  { %1578 = vmatmul.msk.f32.gmra.mxu0 %vm117_vm0, %v105_v14 }
  0x4b   :  { %1579 = vmatmul.msk.f32.gmra.mxu0 %vm117_vm0, %v106_v15 }
  0x53   :  { %1580 = vmatmul.msk.f32.gmra.mxu0 %vm117_vm0, %v107_v16 }
  0x5b   :  { %1581 = vmatmul.msk.f32.gmra.mxu0 %vm117_vm0, %v108_v17 }
  0xa0   :  { %v159_v20 = vpop.f32.mrf.mxu0 }
  0xa1   :  { %1582 = vmatmul.msk.f32.vlgmr.msra.gmra.mxu1 %vm189_vm1, %v159_v20  ;;  %1598 = vmatmul.msk.f32.vlgmr.msra.gmra.mxu2 %vm189_vm1, %v159_v20 }
  0xa8   :  { %v162_v21 = vpop.f32.mrf.mxu0 }
  0xa9   :  { %1583 = vmatmul.msk.f32.gmra.mxu1 %vm189_vm1, %v162_v21  ;;  %1599 = vmatmul.msk.f32.gmra.mxu2 %vm189_vm1, %v162_v21 }
  0xb0   :  { %v165_v22 = vpop.f32.mrf.mxu0 }
  0xb1   :  { %1584 = vmatmul.msk.f32.gmra.mxu1 %vm189_vm1, %v165_v22  ;;  %1600 = vmatmul.msk.f32.gmra.mxu2 %vm189_vm1, %v165_v22 }
  0xb8   :  { %v168_v23 = vpop.f32.mrf.mxu0 }
  0xb9   :  { %1585 = vmatmul.msk.f32.gmra.mxu1 %vm189_vm1, %v168_v23  ;;  %1601 = vmatmul.msk.f32.gmra.mxu2 %vm189_vm1, %v168_v23 }
  0xc0   :  { %v171_v24 = vpop.f32.mrf.mxu0 }
  0xc1   :  { %1586 = vmatmul.msk.f32.gmra.mxu1 %vm189_vm1, %v171_v24  ;;  %1602 = vmatmul.msk.f32.gmra.mxu2 %vm189_vm1, %v171_v24 }
  0xc8   :  { %v174_v25 = vpop.f32.mrf.mxu0 }
  0xc9   :  { %1587 = vmatmul.msk.f32.gmra.mxu1 %vm189_vm1, %v174_v25  ;;  %1603 = vmatmul.msk.f32.gmra.mxu2 %vm189_vm1, %v174_v25 }
  0xd0   :  { %v177_v26 = vpop.f32.mrf.mxu0 }
  0xd1   :  { %1588 = vmatmul.msk.f32.gmra.mxu1 %vm189_vm1, %v177_v26  ;;  %1604 = vmatmul.msk.f32.gmra.mxu2 %vm189_vm1, %v177_v26 }
  0xd8   :  { %v180_v27 = vpop.f32.mrf.mxu0 }
  0xd9   :  { %1589 = vmatmul.msk.f32.gmra.mxu1 %vm189_vm1, %v180_v27  ;;  %1605 = vmatmul.msk.f32.gmra.mxu2 %vm189_vm1, %v180_v27 }
 0x11e   :  { %v231_v31 = vpop.f32.mrf.mxu1 }
 0x11f   :  { %v232_v32 = vadd.f32 %v2087_v30, %v231_v31 }
 0x121   :  { %v255_v34 = vmul.f32 0.70710677, %v232_v32 }
 0x123   :  { %v263_v36 = vmul.f32 2.0, %v255_v34 }
 0x124   :  { %v302_v40 = vpop.f32.mrf.mxu2 }
 0x125   :  { %v1590_v43 = vadd.f32 -1.0, %v263_v36  ;;  %v303_v44 = vadd.f32 %v2093_v35, %v302_v40 }
 0x126   :  { %v234_v45 = vpop.f32.mrf.mxu1 }
 0x127   :  { %v337_v48 = vsub.f32 %v1590_v43, %v2095_v37  ;;  %v2109_v49 = vmul.f32 0.70710677, %v303_v44  ;;  %v235_v50 = vadd.f32 %v2087_v30, %v234_v45  ;;  %v379_v51 = vsub.f32 %v1590_v43, %v2097_v39 }
 0x128   :  { %v421_v52 = vsub.f32 %v1590_v43, %v2101_v42  ;;  %v463_v54 = vsub.f32 %v1590_v43, %v2099_v41 }
 0x129   :  { %v256_v56 = vmul.f32 0.70710677, %v235_v50  ;;  %1166 = vrot.lane.b32.xlu2 %v2109_v49, %s1914_s3  ;;  %1126 = vrot.lane.b32.xlu1 %v2109_v49, %s1915_s6  ;;  %v345_v57 = vand.u32 2147483647, %v337_v48  ;;  %v387_v58 = vand.u32 2147483647, %v379_v51 }
 0x12a   :  { %v429_v59 = vand.u32 2147483647, %v421_v52  ;;  %v471_v60 = vand.u32 2147483647, %v463_v54 }
 0x12b   :  { %v264_v61 = vmul.f32 2.0, %v256_v56  ;;  %v354_v62 = vmul.f32 %v2104_v46, %v345_v57  ;;  %v2125_v63 = vmul.f32 %v2106_v47, %v387_v58 }
 0x12c   :  { %v305_v0 = vpop.f32.mrf.mxu2  ;;  %v2128_v1 = vmul.f32 %v2114_v53, %v429_v59  ;;  %v2131_v2 = vmul.f32 %v2117_v55, %v471_v60 }
 0x12d   :  { %v1591_v3 = vadd.f32 -1.0, %v264_v61  ;;  %v306_v4 = vadd.f32 %v2093_v35, %v305_v0  ;;  %v362_v5 = vmul.f32 -0.5, %v354_v62 }
 0x12e   :  { %v237_v6 = vpop.f32.mrf.mxu1 }
 0x12f   :  { %v2134_v7 = vmul.f32 0.70710677, %v306_v4  ;;  %v238_v8 = vadd.f32 %v2087_v30, %v237_v6  ;;  %v370_v9 = vmul.f32 %v362_v5, %v354_v62  ;;  %v338_v10 = vsub.f32 %v1591_v3, %v2095_v37 }
 0x130   :  { %v380_v11 = vsub.f32 %v1591_v3, %v2097_v39  ;;  %v422_v12 = vsub.f32 %v1591_v3, %v2101_v42  ;;  %v464_v15 = vsub.f32 %v1591_v3, %v2099_v41 }
 0x131   :  { %v257_v13 = vmul.f32 0.70710677, %v238_v8  ;;  %1206 = vrot.lane.b32.xlu2 %v2109_v49, %s1916_s8  ;;  %1208 = vrot.lane.b32.xlu1 %v2134_v7, %s1916_s8  ;;  %v346_v14 = vand.u32 2147483647, %v338_v10 }
 0x132   :  { %1128 = vrot.lane.b32.xlu0 %v2134_v7, %s1915_s6  ;;  %1606 = vmatmul.msk.f32.vlgmr.msrb.gmra.mxu2 %vm189_vm1, %v370_v9  ;;  %v388_v16 = vand.u32 2147483647, %v380_v11  ;;  %v430_v17 = vand.u32 2147483647, %v422_v12  ;;  %v472_v20 = vand.u32 2147483647, %v464_v15 }
 0x133   :  { %v265_v18 = vmul.f32 2.0, %v257_v13  ;;  %v355_v19 = vmul.f32 %v2104_v46, %v346_v14 }
 0x134   :  { %v308_v21 = vpop.f32.mrf.mxu2  ;;  %v2150_v22 = vmul.f32 %v2106_v47, %v388_v16  ;;  %v2153_v23 = vmul.f32 %v2114_v53, %v430_v17  ;;  %v2157_v27 = vmul.f32 %v2117_v55, %v472_v20 }
 0x135   :  { %v1592_v24 = vadd.f32 -1.0, %v265_v18  ;;  %v309_v25 = vadd.f32 %v2093_v35, %v308_v21  ;;  %v363_v26 = vmul.f32 -0.5, %v355_v19 }
 0x136   :  { %v240_v28 = vpop.f32.mrf.mxu1 }
 0x137   :  { %v2159_v29 = vmul.f32 0.70710677, %v309_v25  ;;  %v241_v31 = vadd.f32 %v2087_v30, %v240_v28  ;;  %v371_v32 = vmul.f32 %v363_v26, %v355_v19  ;;  %v339_v33 = vsub.f32 %v1592_v24, %v2095_v37 }
 0x138   :  { %v381_v34 = vsub.f32 %v1592_v24, %v2097_v39  ;;  %v423_v36 = vsub.f32 %v1592_v24, %v2101_v42  ;;  %v465_v43 = vsub.f32 %v1592_v24, %v2099_v41 }
 0x139   :  { %v258_v38 = vmul.f32 0.70710677, %v241_v31  ;;  %1170 = vrot.lane.b32.xlu1 %v2159_v29, %s1914_s3  ;;  %1130 = vrot.lane.b32.xlu2 %v2159_v29, %s1915_s6  ;;  %v347_v40 = vand.u32 2147483647, %v339_v33 }
 0x13a   :  { %1168 = vrot.lane.b32.xlu0 %v2134_v7, %s1914_s3  ;;  %1607 = vmatmul.msk.f32.gmra.mxu2 %vm189_vm1, %v371_v32  ;;  %v389_v44 = vand.u32 2147483647, %v381_v34  ;;  %v431_v45 = vand.u32 2147483647, %v423_v36  ;;  %v473_v51 = vand.u32 2147483647, %v465_v43 }
 0x13b   :  { %v266_v48 = vmul.f32 2.0, %v258_v38  ;;  %v356_v50 = vmul.f32 %v2104_v46, %v347_v40 }
 0x13c   :  { %v311_v52 = vpop.f32.mrf.mxu2  ;;  %v2175_v54 = vmul.f32 %v2106_v47, %v389_v44  ;;  %v2178_v56 = vmul.f32 %v2114_v53, %v431_v45  ;;  %v2182_v60 = vmul.f32 %v2117_v55, %v473_v51 }
 0x13d   :  { %v1593_v57 = vadd.f32 -1.0, %v266_v48  ;;  %v312_v58 = vadd.f32 %v2093_v35, %v311_v52  ;;  %v364_v59 = vmul.f32 -0.5, %v356_v50 }
 0x13e   :  { %v243_v61 = vpop.f32.mrf.mxu1 }
 0x13f   :  { %v2184_v62 = vmul.f32 0.70710677, %v312_v58  ;;  %v244_v0 = vadd.f32 %v2087_v30, %v243_v61  ;;  %v372_v3 = vmul.f32 %v364_v59, %v356_v50  ;;  %v340_v4 = vsub.f32 %v1593_v57, %v2095_v37 }
 0x140   :  { %v382_v5 = vsub.f32 %v1593_v57, %v2097_v39  ;;  %v424_v6 = vsub.f32 %v1593_v57, %v2101_v42  ;;  %v466_v10 = vsub.f32 %v1593_v57, %v2099_v41 }
 0x141   :  { %v259_v8 = vmul.f32 0.70710677, %v244_v0  ;;  %1172 = vrot.lane.b32.xlu1 %v2184_v62, %s1914_s3  ;;  %v348_v9 = vand.u32 2147483647, %v340_v4 }
 0x142   :  { %1210 = vrot.lane.b32.xlu0 %v2159_v29, %s1916_s8  ;;  %1608 = vmatmul.msk.f32.gmra.mxu2 %vm189_vm1, %v372_v3  ;;  %v390_v11 = vand.u32 2147483647, %v382_v5  ;;  %v432_v12 = vand.u32 2147483647, %v424_v6  ;;  %v474_v15 = vand.u32 2147483647, %v466_v10 }
 0x143   :  { %v267_v13 = vmul.f32 2.0, %v259_v8  ;;  %v357_v14 = vmul.f32 %v2104_v46, %v348_v9 }
 0x144   :  { %v314_v16 = vpop.f32.mrf.mxu2  ;;  %v2198_v17 = vmul.f32 %v2106_v47, %v390_v11  ;;  %v2201_v18 = vmul.f32 %v2114_v53, %v432_v12  ;;  %v2205_v24 = vmul.f32 %v2117_v55, %v474_v15 }
 0x145   :  { %v1594_v19 = vadd.f32 -1.0, %v267_v13  ;;  %v315_v20 = vadd.f32 %v2093_v35, %v314_v16  ;;  %v365_v21 = vmul.f32 -0.5, %v357_v14 }
 0x146   :  { %v246_v25 = vpop.f32.mrf.mxu1 }
 0x147   :  { %v2207_v26 = vmul.f32 0.70710677, %v315_v20  ;;  %v247_v28 = vadd.f32 %v2087_v30, %v246_v25  ;;  %v373_v31 = vmul.f32 %v365_v21, %v357_v14  ;;  %v341_v32 = vsub.f32 %v1594_v19, %v2095_v37 }
 0x148   :  { %v383_v33 = vsub.f32 %v1594_v19, %v2097_v39  ;;  %v425_v34 = vsub.f32 %v1594_v19, %v2101_v42  ;;  %v467_v40 = vsub.f32 %v1594_v19, %v2099_v41 }
 0x149   :  { %v260_v36 = vmul.f32 0.70710677, %v247_v28  ;;  %1174 = vrot.lane.b32.xlu1 %v2207_v26, %s1914_s3  ;;  %1134 = vrot.lane.b32.xlu2 %v2207_v26, %s1915_s6  ;;  %v349_v38 = vand.u32 2147483647, %v341_v32 }
 0x14a   :  { %1132 = vrot.lane.b32.xlu0 %v2184_v62, %s1915_s6  ;;  %1609 = vmatmul.msk.f32.gmra.mxu2 %vm189_vm1, %v373_v31  ;;  %v391_v43 = vand.u32 2147483647, %v383_v33  ;;  %v433_v44 = vand.u32 2147483647, %v425_v34  ;;  %v475_v50 = vand.u32 2147483647, %v467_v40 }
 0x14b   :  { %v268_v45 = vmul.f32 2.0, %v260_v36  ;;  %v358_v48 = vmul.f32 %v2104_v46, %v349_v38 }
 0x14c   :  { %v317_v51 = vpop.f32.mrf.mxu2  ;;  %v2223_v52 = vmul.f32 %v2106_v47, %v391_v43  ;;  %v2226_v57 = vmul.f32 %v2114_v53, %v433_v44  ;;  %v2230_v0 = vmul.f32 %v2117_v55, %v475_v50 }
 0x14d   :  { %v1595_v58 = vadd.f32 -1.0, %v268_v45  ;;  %v318_v59 = vadd.f32 %v2093_v35, %v317_v51  ;;  %v366_v61 = vmul.f32 -0.5, %v358_v48 }
 0x14e   :  { %v249_v3 = vpop.f32.mrf.mxu1 }
 0x14f   :  { %v2232_v4 = vmul.f32 0.70710677, %v318_v59  ;;  %v250_v5 = vadd.f32 %v2087_v30, %v249_v3  ;;  %v374_v6 = vmul.f32 %v366_v61, %v358_v48  ;;  %v342_v8 = vsub.f32 %v1595_v58, %v2095_v37 }
 0x150   :  { %v384_v9 = vsub.f32 %v1595_v58, %v2097_v39  ;;  %v426_v10 = vsub.f32 %v1595_v58, %v2101_v42  ;;  %v468_v13 = vsub.f32 %v1595_v58, %v2099_v41 }
 0x151   :  { %v261_v11 = vmul.f32 0.70710677, %v250_v5  ;;  %1176 = vrot.lane.b32.xlu1 %v2232_v4, %s1914_s3  ;;  %1136 = vrot.lane.b32.xlu2 %v2232_v4, %s1915_s6  ;;  %v350_v12 = vand.u32 2147483647, %v342_v8 }
 0x152   :  { %1212 = vrot.lane.b32.xlu0 %v2184_v62, %s1916_s8  ;;  %1610 = vmatmul.msk.f32.gmra.mxu2 %vm189_vm1, %v374_v6  ;;  %v392_v14 = vand.u32 2147483647, %v384_v9  ;;  %v434_v15 = vand.u32 2147483647, %v426_v10  ;;  %v476_v20 = vand.u32 2147483647, %v468_v13 }
 0x153   :  { %v269_v16 = vmul.f32 2.0, %v261_v11  ;;  %v359_v19 = vmul.f32 %v2104_v46, %v350_v12 }
 0x154   :  { %v320_v21 = vpop.f32.mrf.mxu2  ;;  %v2248_v25 = vmul.f32 %v2106_v47, %v392_v14  ;;  %v2251_v28 = vmul.f32 %v2114_v53, %v434_v15  ;;  %v2255_v34 = vmul.f32 %v2117_v55, %v476_v20 }
 0x155   :  { %v1596_v31 = vadd.f32 -1.0, %v269_v16  ;;  %v321_v32 = vadd.f32 %v2093_v35, %v320_v21  ;;  %v367_v33 = vmul.f32 -0.5, %v359_v19 }
 0x156   :  { %v252_v36 = vpop.f32.mrf.mxu1 }
 0x157   :  { %v2257_v38 = vmul.f32 0.70710677, %v321_v32  ;;  %v253_v40 = vadd.f32 %v2087_v30, %v252_v36  ;;  %v375_v43 = vmul.f32 %v367_v33, %v359_v19  ;;  %v343_v44 = vsub.f32 %v1596_v31, %v2095_v37 }
 0x158   :  { %v385_v45 = vsub.f32 %v1596_v31, %v2097_v39  ;;  %v427_v48 = vsub.f32 %v1596_v31, %v2101_v42  ;;  %v469_v58 = vsub.f32 %v1596_v31, %v2099_v41 }
 0x159   :  { %v262_v50 = vmul.f32 0.70710677, %v253_v40  ;;  %1138 = vrot.lane.b32.xlu2 %v2257_v38, %s1915_s6  ;;  %v351_v51 = vand.u32 2147483647, %v343_v44 }
 0x15a   :  { %1214 = vrot.lane.b32.xlu0 %v2207_v26, %s1916_s8  ;;  %1611 = vmatmul.msk.f32.gmra.mxu2 %vm189_vm1, %v375_v43  ;;  %v393_v30 = vand.u32 2147483647, %v385_v45  ;;  %v435_v59 = vand.u32 2147483647, %v427_v48  ;;  %v477_v5 = vand.u32 2147483647, %v469_v58 }
 0x15b   :  { %v270_v61 = vmul.f32 2.0, %v262_v50  ;;  %v360_v3 = vmul.f32 %v2104_v46, %v351_v51  ;;  %v406_v43 = vmul.f32 -0.5, %v2175_v54  ;;  %v407_v45 = vmul.f32 -0.5, %v2198_v17 }
 0x15c   :  { %v323_v6 = vpop.f32.mrf.mxu2  ;;  %v402_v8 = vmul.f32 %v2106_v47, %v393_v30  ;;  %v2272_v9 = vmul.f32 %v2114_v53, %v435_v59  ;;  %v2276_v13 = vmul.f32 %v2117_v55, %v477_v5  ;;  %v446_v59 = vmul.f32 -0.5, %v2128_v1 }
 0x15d   :  { %v1597_v10 = vadd.f32 -1.0, %v270_v61  ;;  %v324_v11 = vadd.f32 %v2093_v35, %v323_v6  ;;  %v368_v12 = vmul.f32 -0.5, %v360_v3  ;;  %v414_v44 = vmul.f32 %v406_v43, %v2175_v54 }
 0x15e   :  { %v415_v48 = vmul.f32 %v407_v45, %v2198_v17  ;;  %v410_v54 = vmul.f32 -0.5, %v402_v8  ;;  %v447_v61 = vmul.f32 -0.5, %v2153_v23  ;;  %v449_v6 = vmul.f32 -0.5, %v2201_v18 }
 0x15f   :  { %v470_v14 = vsub.f32 %v1597_v10, %v2099_v41  ;;  %v2279_v15 = vmul.f32 0.70710677, %v324_v11  ;;  %v376_v16 = vmul.f32 %v368_v12, %v360_v3  ;;  %v344_v19 = vsub.f32 %v1597_v10, %v2095_v37 }
 0x160   :  { %v386_v20 = vsub.f32 %v1597_v10, %v2097_v39  ;;  %v428_v21 = vsub.f32 %v1597_v10, %v2101_v42  ;;  %v418_v58 = vmul.f32 %v410_v54, %v402_v8  ;;  %v448_v3 = vmul.f32 -0.5, %v2178_v56 }
 0x161   :  { %v478_v31 = vand.u32 2147483647, %v470_v14  ;;  %1180 = vrot.lane.b32.xlu1 %v2279_v15, %s1914_s3  ;;  %1140 = vrot.lane.b32.xlu2 %v2279_v15, %s1915_s6  ;;  %v352_v35 = vand.u32 2147483647, %v344_v19  ;;  %v457_v8 = vmul.f32 %v449_v6, %v2201_v18 }
 0x162   :  { %1216 = vrot.lane.b32.xlu0 %v2232_v4, %s1916_s8  ;;  %1612 = vmatmul.msk.f32.gmra.mxu2 %vm189_vm1, %v376_v16  ;;  %v394_v41 = vand.u32 2147483647, %v386_v20  ;;  %v436_v32 = vand.u32 2147483647, %v428_v21  ;;  %v456_v5 = vmul.f32 %v448_v3, %v2178_v56  ;;  %v452_v56 = vmul.f32 -0.5, %v2272_v9 }
 0x163   :  { %v361_v37 = vmul.f32 %v2104_v46, %v352_v35  ;;  %v2293_v39 = vmul.f32 %v2117_v55, %v478_v31  ;;  %v404_v46 = vmul.f32 -0.5, %v2125_v63 }
 0x164   :  { %v403_v42 = vmul.f32 %v2106_v47, %v394_v41  ;;  %v445_v33 = vmul.f32 %v2114_v53, %v436_v32  ;;  %v405_v47 = vmul.f32 -0.5, %v2150_v22  ;;  %v460_v12 = vmul.f32 %v452_v56, %v2272_v9 }
 0x165   :  { %v369_v36 = vmul.f32 -0.5, %v361_v37  ;;  %v412_v55 = vmul.f32 %v404_v46, %v2125_v63  ;;  %v408_v63 = vmul.f32 -0.5, %v2223_v52  ;;  %v490_v9 = vmul.f32 -0.5, %v2182_v60 }
 0x166   :  { %v413_v53 = vmul.f32 %v405_v47, %v2150_v22  ;;  %v409_v22 = vmul.f32 -0.5, %v2248_v25  ;;  %v411_v30 = vmul.f32 -0.5, %v403_v42  ;;  %v453_v18 = vmul.f32 -0.5, %v445_v33 }
 0x167   :  { %v377_v40 = vmul.f32 %v369_v36, %v361_v37  ;;  %v416_v50 = vmul.f32 %v408_v63, %v2223_v52  ;;  %v454_v52 = vmul.f32 %v446_v59, %v2128_v1  ;;  %v450_v1 = vmul.f32 -0.5, %v2226_v57 }
 0x168   :  { %v417_v51 = vmul.f32 %v409_v22, %v2248_v25  ;;  %v419_v17 = vmul.f32 %v411_v30, %v403_v42  ;;  %v455_v25 = vmul.f32 %v447_v61, %v2153_v23  ;;  %v451_v23 = vmul.f32 -0.5, %v2251_v28 }
 0x169   :  { %1178 = vrot.lane.b32.xlu1 %v2257_v38, %s1914_s3  ;;  %1218 = vrot.lane.b32.xlu2 %v2257_v38, %s1916_s8  ;;  %v458_v10 = vmul.f32 %v450_v1, %v2226_v57  ;;  %v461_v14 = vmul.f32 %v453_v18, %v445_v33  ;;  %v488_v57 = vmul.f32 -0.5, %v2131_v2  ;;  %v498_v35 = vmul.f32 %v490_v9, %v2182_v60 }
 0x16a   :  { %1220 = vrot.lane.b32.xlu0 %v2279_v15, %s1916_s8  ;;  %1613 = vmatmul.msk.f32.vlgmr.msra.gmra.mxu3 %vm189_vm1, %v377_v40  ;;  %v459_v11 = vmul.f32 %v451_v23, %v2251_v28  ;;  %v489_v28 = vmul.f32 -0.5, %v2157_v27  ;;  %v491_v41 = vmul.f32 -0.5, %v2205_v24  ;;  %v493_v60 = vmul.f32 -0.5, %v2255_v34 }
 0x16b   :  { %v496_v19 = vmul.f32 %v488_v57, %v2131_v2 }
 0x16c   :  { %v497_v21 = vmul.f32 %v489_v28, %v2157_v27  ;;  %v499_v32 = vmul.f32 %v491_v41, %v2205_v24  ;;  %v492_v27 = vmul.f32 -0.5, %v2230_v0  ;;  %v501_v36 = vmul.f32 %v493_v60, %v2255_v34 }
 0x16d   :  { %v494_v24 = vmul.f32 -0.5, %v2276_v13 }
 0x16e   :  { %v500_v42 = vmul.f32 %v492_v27, %v2230_v0  ;;  %v495_v0 = vmul.f32 -0.5, %v2293_v39 }
 0x16f   :  { %v502_v46 = vmul.f32 %v494_v24, %v2276_v13  ;;  %v899_v13 = vld [vmem:[%s2627_s9] sm:$0xff] }
 0x170   :  { %v503_v47 = vmul.f32 %v495_v0, %v2293_v39  ;;  %1680 = vmatpush.msrb.mxu1 %v899_v13  ;;  %1012 = vmatpush.msrb.mxu0 %v899_v13 }
 0x171   :  { %1681 = vmatpush.msra.mxu2 %v899_v13 }
 0x172   :  { %1614 = vmatmul.msk.f32.gmra.mxu3 %vm189_vm1, %v412_v55 }
 0x17a   :  { %1615 = vmatmul.msk.f32.gmra.mxu3 %vm189_vm1, %v413_v53 }
 0x182   :  { %1616 = vmatmul.msk.f32.gmra.mxu3 %vm189_vm1, %v414_v44 }
 0x18a   :  { %1617 = vmatmul.msk.f32.gmra.mxu3 %vm189_vm1, %v415_v48 }
 0x192   :  { %1618 = vmatmul.msk.f32.gmra.mxu3 %vm189_vm1, %v416_v50 }
 0x19a   :  { %1619 = vmatmul.msk.f32.gmra.mxu3 %vm189_vm1, %v417_v51 }
 0x1a2   :  { %1620 = vmatmul.msk.f32.gmra.mxu3 %vm189_vm1, %v418_v58 }
 0x1aa   :  { %1621 = vmatmul.msk.f32.gmra.mxu3 %vm189_vm1, %v419_v17 }
 0x1b2   :  { %1622 = vmatmul.msk.f32.gmra.mxu3 %vm189_vm1, %v454_v52 }
 0x1b5   :  { %v619_v63 = vpop.f32.mrf.mxu2 }
 0x1ba   :  { %1623 = vmatmul.msk.f32.gmra.mxu3 %vm189_vm1, %v455_v25 }
 0x1bd   :  { %v622_v22 = vpop.f32.mrf.mxu2 }
 0x1c2   :  { %1624 = vmatmul.msk.f32.gmra.mxu3 %vm189_vm1, %v456_v5 }
 0x1c5   :  { %v625_v17 = vpop.f32.mrf.mxu2 }
 0x1ca   :  { %1625 = vmatmul.msk.f32.gmra.mxu3 %vm189_vm1, %v457_v8 }
 0x1d2   :  { %1626 = vmatmul.msk.f32.gmra.mxu3 %vm189_vm1, %v458_v10 }
 0x1da   :  { %1627 = vmatmul.msk.f32.gmra.mxu3 %vm189_vm1, %v459_v11 }
 0x1e2   :  { %1628 = vmatmul.msk.f32.gmra.mxu3 %vm189_vm1, %v460_v12  ;;  %v628_v12 = vpop.f32.mrf.mxu2 }
 0x1ea   :  { %1629 = vmatmul.msk.f32.gmra.mxu3 %vm189_vm1, %v461_v14 }
 0x1ed   :  { %v2347_v16 = vpop.f32.mrf.mxu3 }
 0x1f2   :  { %1630 = vmatmul.msk.f32.gmra.mxu3 %vm189_vm1, %v496_v19 }
 0x1f5   :  { %v643_v20 = vpop.f32.mrf.mxu3 }
 0x1f6   :  { %v715_v54 = vmax.f32 %v619_v63, %v643_v20 }
 0x1fa   :  { %1631 = vmatmul.msk.f32.gmra.mxu3 %vm189_vm1, %v497_v21 }
 0x1fd   :  { %v2355_v31 = vpop.f32.mrf.mxu3 }
 0x1fe   :  { %v716_v5 = vmax.f32 %v622_v22, %v2355_v31 }
 0x202   :  { %1632 = vmatmul.msk.f32.gmra.mxu3 %vm189_vm1, %v498_v35 }
 0x205   :  { %v2360_v2 = vpop.f32.mrf.mxu3 }
 0x20a   :  { %1633 = vmatmul.msk.f32.gmra.mxu3 %vm189_vm1, %v499_v32 }
 0x20d   :  { %v2365_v37 = vpop.f32.mrf.mxu3 }
 0x20e   :  { %v718_v13 = vmax.f32 %v628_v12, %v2365_v37 }
 0x212   :  { %1634 = vmatmul.msk.f32.gmra.mxu3 %vm189_vm1, %v500_v42 }
 0x215   :  { %v2370_v33 = vpop.f32.mrf.mxu3 }
 0x21a   :  { %1635 = vmatmul.msk.f32.gmra.mxu3 %vm189_vm1, %v501_v36 }
 0x21d   :  { %v2375_v40 = vpop.f32.mrf.mxu3 }
 0x222   :  { %1636 = vmatmul.msk.f32.gmra.mxu3 %vm189_vm1, %v502_v46 }
 0x225   :  { %v2380_v55 = vpop.f32.mrf.mxu3 }
 0x22a   :  { %1637 = vmatmul.msk.f32.gmra.mxu3 %vm189_vm1, %v503_v47 }
 0x22d   :  { %v2384_v53 = vpop.f32.mrf.mxu3 }
 0x235   :  { %v667_v34 = vpop.f32.mrf.mxu3 }
 0x236   :  { %v723_v58 = vmax.f32 %v715_v54, %v667_v34  ;;  %v631_v54 = vpop.f32.mrf.mxu2 }
 0x23d   :  { %v670_v43 = vpop.f32.mrf.mxu3 }
 0x23e   :  { %v724_v10 = vmax.f32 %v716_v5, %v670_v43 }
 0x245   :  { %v2386_v44 = vpop.f32.mrf.mxu3 }
 0x24d   :  { %v2388_v45 = vpop.f32.mrf.mxu3 }
 0x255   :  { %v2393_v48 = vpop.f32.mrf.mxu3 }
 0x25d   :  { %v2395_v39 = vpop.f32.mrf.mxu3 }
 0x265   :  { %v2397_v50 = vpop.f32.mrf.mxu3 }
 0x26d   :  { %v2399_v51 = vpop.f32.mrf.mxu3 }
 0x275   :  { %v691_v30 = vpop.f32.mrf.mxu3 }
 0x276   :  { %v731_v59 = vmax.f32 %v723_v58, %v691_v30 }
 0x278   :  { %v739_v52 = vsub.f32 %v619_v63, %v731_v59  ;;  %v763_v61 = vsub.f32 %v643_v20, %v731_v59  ;;  %v787_v25 = vsub.f32 %v667_v34, %v731_v59  ;;  %v811_v3 = vsub.f32 %v691_v30, %v731_v59 }
 0x279   :  { %v717_v20 = vmax.f32 %v625_v17, %v2360_v2 }
 0x27a   :  { %v747_v6 = vmul.f32 1.442695, %v739_v52  ;;  %v771_v8 = vmul.f32 1.442695, %v763_v61  ;;  %v795_v1 = vmul.f32 1.442695, %v787_v25  ;;  %v726_v25 = vmax.f32 %v718_v13, %v2388_v45 }
 0x27b   :  { %v819_v23 = vmul.f32 1.442695, %v811_v3  ;;  %v725_v32 = vmax.f32 %v717_v20, %v2386_v44 }
 0x27c   :  { %1700 = vpow2.f32 %v747_v6 }
 0x27d   :  { %1702 = vpow2.f32 %v771_v8  ;;  %v694_v11 = vpop.f32.mrf.mxu3  ;;  %v719_v8 = vmax.f32 %v631_v54, %v2370_v33 }
 0x27e   :  { %v732_v56 = vmax.f32 %v724_v10, %v694_v11  ;;  %1704 = vpow2.f32 %v795_v1 }
 0x27f   :  { %1706 = vpow2.f32 %v819_v23 }
 0x280   :  { %v740_v18 = vsub.f32 %v622_v22, %v732_v56  ;;  %v764_v14 = vsub.f32 %v2355_v31, %v732_v56  ;;  %v788_v57 = vsub.f32 %v670_v43, %v732_v56  ;;  %v812_v19 = vsub.f32 %v694_v11, %v732_v56 }
 0x282   :  { %v1701_v28 = vpop.eup %1700  ;;  %v749_v21 = vmul.f32 1.442695, %v740_v18  ;;  %v773_v9 = vmul.f32 1.442695, %v764_v14  ;;  %v797_v41 = vmul.f32 1.442695, %v788_v57 }
 0x283   :  { %v1703_v35 = vpop.eup %1702  ;;  %v821_v60 = vmul.f32 1.442695, %v812_v19 }
 0x284   :  { %v835_v27 = vadd.f32 %v1703_v35, %v1701_v28  ;;  %1708 = vpow2.f32 %v749_v21  ;;  %v1705_v42 = vpop.eup %1704 }
 0x285   :  { %1710 = vpow2.f32 %v773_v9  ;;  %v697_v36 = vpop.f32.mrf.mxu3  ;;  %v1707_v46 = vpop.eup %1706 }
 0x286   :  { %v843_v24 = vadd.f32 %v1705_v42, %v835_v27  ;;  %v733_v31 = vmax.f32 %v725_v32, %v697_v36  ;;  %1712 = vpow2.f32 %v797_v41 }
 0x287   :  { %1714 = vpow2.f32 %v821_v60  ;;  %v634_v60 = vpop.f32.mrf.mxu2 }
 0x288   :  { %v851_v0 = vadd.f32 %v1707_v46, %v843_v24  ;;  %v741_v47 = vsub.f32 %v625_v17, %v733_v31  ;;  %v765_v34 = vsub.f32 %v2360_v2, %v733_v31  ;;  %v789_v43 = vsub.f32 %v2386_v44, %v733_v31 }
 0x289   :  { %v813_v63 = vsub.f32 %v697_v36, %v733_v31  ;;  %v720_v31 = vmax.f32 %v634_v60, %v2375_v40 }
 0x28a   :  { %v1709_v22 = vpop.eup %1708  ;;  %1716 = vrcp.f32 %v851_v0  ;;  %v751_v58 = vmul.f32 1.442695, %v741_v47  ;;  %v775_v30 = vmul.f32 1.442695, %v765_v34  ;;  %v799_v59 = vmul.f32 1.442695, %v789_v43 }
 0x28b   :  { %v1711_v52 = vpop.eup %1710  ;;  %v823_v61 = vmul.f32 1.442695, %v813_v63 }
 0x28c   :  { %v836_v3 = vadd.f32 %v1711_v52, %v1709_v22  ;;  %1718 = vpow2.f32 %v751_v58  ;;  %v1713_v17 = vpop.eup %1712 }
 0x28d   :  { %1720 = vpow2.f32 %v775_v30  ;;  %v700_v2 = vpop.f32.mrf.mxu3  ;;  %v1715_v6 = vpop.eup %1714 }
 0x28e   :  { %v844_v44 = vadd.f32 %v1713_v17, %v836_v3  ;;  %1722 = vpow2.f32 %v799_v59  ;;  %v734_v5 = vmax.f32 %v726_v25, %v700_v2 }
 0x28f   :  { %1724 = vpow2.f32 %v823_v61 }
 0x290   :  { %v1717_v1 = vpop.eup %1716  ;;  %v852_v10 = vadd.f32 %v1715_v6, %v844_v44  ;;  %v742_v23 = vsub.f32 %v628_v12, %v734_v5  ;;  %v766_v11 = vsub.f32 %v2365_v37, %v734_v5  ;;  %v790_v56 = vsub.f32 %v2388_v45, %v734_v5 }
 0x291   :  { %v814_v18 = vsub.f32 %v700_v2, %v734_v5  ;;  %v867_v14 = vmul.f32 %v1717_v1, %v1701_v28  ;;  %v2412_v57 = vmul.f32 %v1717_v1, %v1703_v35  ;;  %v2414_v19 = vmul.f32 %v1717_v1, %v1705_v42 }
 0x292   :  { %v1719_v20 = vpop.eup %1718  ;;  %1726 = vrcp.f32 %v852_v10  ;;  %v753_v21 = vmul.f32 1.442695, %v742_v23  ;;  %v777_v9 = vmul.f32 1.442695, %v766_v11  ;;  %v801_v41 = vmul.f32 1.442695, %v790_v56 }
 0x293   :  { %v1721_v32 = vpop.eup %1720  ;;  %v825_v27 = vmul.f32 1.442695, %v814_v18  ;;  %1638 = vmatmul.msk.f32.vlgmr.msrb.gmra.mxu0 %vm900_vm2, %v867_v14  ;;  %v2417_v12 = vmul.f32 %v1717_v1, %v1707_v46  ;;  %v727_v45 = vmax.f32 %v719_v8, %v2393_v48 }
 0x294   :  { %v1723_v37 = vpop.eup %1722  ;;  %v837_v28 = vadd.f32 %v1721_v32, %v1719_v20  ;;  %1728 = vpow2.f32 %v753_v21 }
 0x295   :  { %v1725_v35 = vpop.eup %1724  ;;  %1730 = vpow2.f32 %v777_v9  ;;  %v703_v42 = vpop.f32.mrf.mxu3 }
 0x296   :  { %v845_v36 = vadd.f32 %v1723_v37, %v837_v28  ;;  %1732 = vpow2.f32 %v801_v41  ;;  %v735_v24 = vmax.f32 %v727_v45, %v703_v42 }
 0x297   :  { %1734 = vpow2.f32 %v825_v27 }
 0x298   :  { %v1727_v0 = vpop.eup %1726  ;;  %v853_v47 = vadd.f32 %v1725_v35, %v845_v36  ;;  %v743_v34 = vsub.f32 %v631_v54, %v735_v24  ;;  %v767_v46 = vsub.f32 %v2370_v33, %v735_v24  ;;  %v791_v43 = vsub.f32 %v2393_v48, %v735_v24 }
 0x299   :  { %v815_v13 = vsub.f32 %v703_v42, %v735_v24  ;;  %v868_v63 = vmul.f32 %v1727_v0, %v1709_v22  ;;  %v2423_v58 = vmul.f32 %v1727_v0, %v1711_v52  ;;  %v2425_v30 = vmul.f32 %v1727_v0, %v1713_v17  ;;  %v637_v17 = vpop.f32.mrf.mxu2 }
 0x29a   :  { %v1729_v59 = vpop.eup %1728  ;;  %1736 = vrcp.f32 %v853_v47  ;;  %v755_v61 = vmul.f32 1.442695, %v743_v34  ;;  %v779_v25 = vmul.f32 1.442695, %v767_v46  ;;  %v803_v3 = vmul.f32 1.442695, %v791_v43 }
 0x29b   :  { %v1731_v2 = vpop.eup %1730  ;;  %v827_v44 = vmul.f32 1.442695, %v815_v13  ;;  %1639 = vmatmul.msk.f32.gmra.mxu0 %vm900_vm2, %v868_v63  ;;  %v2428_v54 = vmul.f32 %v1727_v0, %v1715_v6  ;;  %v728_v48 = vmax.f32 %v720_v31, %v2395_v39  ;;  %v721_v10 = vmax.f32 %v637_v17, %v2380_v55 }
 0x29c   :  { %v1733_v33 = vpop.eup %1732  ;;  %v838_v5 = vadd.f32 %v1731_v2, %v1729_v59  ;;  %1738 = vpow2.f32 %v755_v61  ;;  %v722_v47 = vmax.f32 %v2347_v16, %v2384_v53 }
 0x29d   :  { %v1735_v22 = vpop.eup %1734  ;;  %1740 = vpow2.f32 %v779_v25  ;;  %v706_v52 = vpop.f32.mrf.mxu3 }
 0x29e   :  { %v846_v8 = vadd.f32 %v1733_v33, %v838_v5  ;;  %1742 = vpow2.f32 %v803_v3  ;;  %v736_v1 = vmax.f32 %v728_v48, %v706_v52 }
 0x29f   :  { %1744 = vpow2.f32 %v827_v44 }
 0x2a0   :  { %v1737_v23 = vpop.eup %1736  ;;  %v854_v11 = vadd.f32 %v1735_v22, %v846_v8  ;;  %v744_v56 = vsub.f32 %v634_v60, %v736_v1  ;;  %v768_v6 = vsub.f32 %v2375_v40, %v736_v1  ;;  %v792_v18 = vsub.f32 %v2395_v39, %v736_v1 }
 0x2a1   :  { %v816_v14 = vsub.f32 %v706_v52, %v736_v1  ;;  %v869_v21 = vmul.f32 %v1737_v23, %v1719_v20  ;;  %v2434_v9 = vmul.f32 %v1737_v23, %v1721_v32  ;;  %v2436_v41 = vmul.f32 %v1737_v23, %v1723_v37 }
 0x2a2   :  { %v1739_v27 = vpop.eup %1738  ;;  %1746 = vrcp.f32 %v854_v11  ;;  %v757_v45 = vmul.f32 1.442695, %v744_v56  ;;  %v781_v28 = vmul.f32 1.442695, %v768_v6  ;;  %v805_v42 = vmul.f32 1.442695, %v792_v18 }
 0x2a3   :  { %v1741_v36 = vpop.eup %1740  ;;  %v829_v24 = vmul.f32 1.442695, %v816_v14  ;;  %1640 = vmatmul.msk.f32.gmra.mxu0 %vm900_vm2, %v869_v21  ;;  %v2439_v60 = vmul.f32 %v1737_v23, %v1725_v35  ;;  %v729_v39 = vmax.f32 %v721_v10, %v2397_v50 }
 0x2a4   :  { %v1743_v40 = vpop.eup %1742  ;;  %v839_v31 = vadd.f32 %v1741_v36, %v1739_v27  ;;  %1748 = vpow2.f32 %v757_v45 }
 0x2a5   :  { %v1745_v20 = vpop.eup %1744  ;;  %1750 = vpow2.f32 %v781_v28  ;;  %v709_v32 = vpop.f32.mrf.mxu3 }
 0x2a6   :  { %v847_v37 = vadd.f32 %v1743_v40, %v839_v31  ;;  %1752 = vpow2.f32 %v805_v42  ;;  %v737_v0 = vmax.f32 %v729_v39, %v709_v32 }
 0x2a7   :  { %1754 = vpow2.f32 %v829_v24 }
 0x2a8   :  { %v1747_v34 = vpop.eup %1746  ;;  %v855_v46 = vadd.f32 %v1745_v20, %v847_v37  ;;  %v745_v43 = vsub.f32 %v637_v17, %v737_v0  ;;  %v769_v35 = vsub.f32 %v2380_v55, %v737_v0  ;;  %v793_v13 = vsub.f32 %v2397_v50, %v737_v0 }
 0x2a9   :  { %v817_v63 = vsub.f32 %v709_v32, %v737_v0  ;;  %v870_v61 = vmul.f32 %v1747_v34, %v1729_v59  ;;  %v2446_v25 = vmul.f32 %v1747_v34, %v1731_v2  ;;  %v2448_v3 = vmul.f32 %v1747_v34, %v1733_v33 }
 0x2aa   :  { %v1749_v44 = vpop.eup %1748  ;;  %1756 = vrcp.f32 %v855_v46  ;;  %v759_v48 = vmul.f32 1.442695, %v745_v43  ;;  %v783_v5 = vmul.f32 1.442695, %v769_v35  ;;  %v807_v52 = vmul.f32 1.442695, %v793_v13 }
 0x2ab   :  { %v1751_v8 = vpop.eup %1750  ;;  %v831_v1 = vmul.f32 1.442695, %v817_v63  ;;  %1641 = vmatmul.msk.f32.gmra.mxu0 %vm900_vm2, %v870_v61  ;;  %v2451_v17 = vmul.f32 %v1747_v34, %v1735_v22  ;;  %v730_v50 = vmax.f32 %v722_v47, %v2399_v51 }
 0x2ac   :  { %v1753_v55 = vpop.eup %1752  ;;  %v840_v10 = vadd.f32 %v1751_v8, %v1749_v44  ;;  %1758 = vpow2.f32 %v759_v48 }
 0x2ad   :  { %v1755_v59 = vpop.eup %1754  ;;  %1760 = vpow2.f32 %v783_v5  ;;  %v712_v2 = vpop.f32.mrf.mxu3 }
 0x2ae   :  { %v848_v33 = vadd.f32 %v1753_v55, %v840_v10  ;;  %1762 = vpow2.f32 %v807_v52  ;;  %v738_v23 = vmax.f32 %v730_v50, %v712_v2 }
 0x2af   :  { %1764 = vpow2.f32 %v831_v1 }
 0x2b0   :  { %v1757_v11 = vpop.eup %1756  ;;  %v856_v56 = vadd.f32 %v1755_v59, %v848_v33  ;;  %v746_v6 = vsub.f32 %v2347_v16, %v738_v23  ;;  %v770_v18 = vsub.f32 %v2384_v53, %v738_v23  ;;  %v794_v22 = vsub.f32 %v2399_v51, %v738_v23 }
 0x2b1   :  { %v818_v14 = vsub.f32 %v712_v2, %v738_v23  ;;  %v871_v21 = vmul.f32 %v1757_v11, %v1739_v27  ;;  %v879_v45 = vmul.f32 %v1757_v11, %v1741_v36  ;;  %v887_v28 = vmul.f32 %v1757_v11, %v1743_v40 }
 0x2b2   :  { %v1759_v42 = vpop.eup %1758  ;;  %1766 = vrcp.f32 %v856_v56  ;;  %v761_v24 = vmul.f32 1.442695, %v746_v6  ;;  %v785_v39 = vmul.f32 1.442695, %v770_v18  ;;  %v809_v32 = vmul.f32 1.442695, %v794_v22 }
 0x2b3   :  { %v1761_v31 = vpop.eup %1760  ;;  %1642 = vmatmul.msk.f32.gmra.mxu0 %vm900_vm2, %v871_v21  ;;  %1650 = vmatmul.msk.f32.vlgmr.msrb.gmra.mxu1 %vm900_vm2, %v879_v45  ;;  %v2459_v37 = vmul.f32 %v1757_v11, %v1745_v20  ;;  %v833_v51 = vmul.f32 1.442695, %v818_v14  ;;  %v1299_v6 = vld [vmem:[#allocation8 + $0x28] sm:$0xff] }
 0x2b4   :  { %v1763_v16 = vpop.eup %1762  ;;  %v841_v53 = vadd.f32 %v1761_v31, %v1759_v42  ;;  %1768 = vpow2.f32 %v761_v24  ;;  %1317 = vmatpush.msra.mxu0 %v1299_v6  ;;  %v1325_v6 = vld [vmem:[#allocation8 + $0x30] sm:$0xff] }
 0x2b5   :  { %v1765_v0 = vpop.eup %1764  ;;  %1770 = vpow2.f32 %v785_v39 }
 0x2b6   :  { %v849_v27 = vadd.f32 %v1763_v16, %v841_v53  ;;  %1772 = vpow2.f32 %v809_v32  ;;  %v1298_v53 = vld [vmem:[#allocation8 + $0x20] sm:$0xff] }
 0x2b7   :  { %1774 = vpow2.f32 %v833_v51  ;;  %v1250_v51 = vld [vmem:[#allocation8 + $0x18] sm:$0xff]  ;;  %1318 = vmatpush.msra.mxu0 %v1298_v53 }
 0x2b8   :  { %v1767_v36 = vpop.eup %1766  ;;  %v857_v40 = vadd.f32 %v1765_v0, %v849_v27  ;;  %1268 = vmatpush.msrb.mxu2 %v1250_v51  ;;  %v1380_v53 = vld [vmem:[#allocation8 + $0x58] sm:$0xff]  ;;  %v1407_v51 = vld [vmem:[#allocation8 + $0x68] sm:$0xff] }
 0x2b9   :  { %v896_v47 = vmul.f32 %v1767_v36, %v1755_v59  ;;  %v872_v34 = vmul.f32 %v1767_v36, %v1749_v44  ;;  %v880_v46 = vmul.f32 %v1767_v36, %v1751_v8  ;;  %v888_v43 = vmul.f32 %v1767_v36, %v1753_v55  ;;  %v1129_v36 = vpop.permute.xlu0 %1128 }
 0x2ba   :  { %v1769_v35 = vpop.eup %1768  ;;  %1776 = vrcp.f32 %v857_v40  ;;  %v1249_v40 = vld [vmem:[#allocation8 + $0x10] sm:$0xff] }
 0x2bb   :  { %v1771_v13 = vpop.eup %1770  ;;  %1643 = vmatmul.msk.f32.gmra.mxu0 %vm900_vm2, %v872_v34  ;;  %1651 = vmatmul.msk.f32.gmra.mxu1 %vm900_vm2, %v880_v46  ;;  %v1247_v46 = vld [vmem:[#allocation8 + $0x8] sm:$0xff] }
 0x2bc   :  { %v842_v20 = vadd.f32 %v1771_v13, %v1769_v35  ;;  %1667 = vmatmul.msk.f32.vlgmr.msra.gmra.mxu2 %vm900_vm2, %v896_v47  ;;  %v1773_v63 = vpop.eup %1772 }
 0x2bd   :  { %v1775_v61 = vpop.eup %1774  ;;  %1269 = vmatpush.msrb.mxu2 %v1249_v40 }
 0x2be   :  { %v850_v48 = vadd.f32 %v1773_v63, %v842_v20 }
 0x2bf   :  { %1291 = vmatpush.msra.mxu2 %v1247_v46  ;;  %v1406_v46 = vld [vmem:[#allocation8 + $0x60] sm:$0xff] }
 0x2c0   :  { %v1777_v5 = vpop.eup %1776  ;;  %v858_v52 = vadd.f32 %v1775_v61, %v850_v48 }
 0x2c1   :  { %v873_v1 = vmul.f32 %v1777_v5, %v1759_v42  ;;  %v881_v50 = vmul.f32 %v1777_v5, %v1761_v31  ;;  %v897_v44 = vmul.f32 %v1777_v5, %v1765_v0  ;;  %v889_v8 = vmul.f32 %v1777_v5, %v1763_v16  ;;  %v1169_v34 = vpop.permute.xlu0 %1168 }
 0x2c2   :  { %1778 = vrcp.f32 %v858_v52 }
 0x2c3   :  { %1644 = vmatmul.msk.f32.gmra.mxu0 %vm900_vm2, %v873_v1  ;;  %1652 = vmatmul.msk.f32.gmra.mxu1 %vm900_vm2, %v881_v50 }
 0x2c4   :  { %1668 = vmatmul.msk.f32.gmra.mxu2 %vm900_vm2, %v897_v44  ;;  %v1353_v44 = vld [vmem:[#allocation8 + $0x48] sm:$0xff] }
 0x2c5   :  { %1371 = vmatpush.msrb.mxu0 %v1353_v44  ;;  %v1433_v44 = vld [vmem:[#allocation8 + $0x70] sm:$0xff] }
 0x2c8   :  { %v1779_v55 = vpop.eup %1778 }
 0x2c9   :  { %v874_v10 = vmul.f32 %v1779_v55, %v1769_v35  ;;  %v882_v59 = vmul.f32 %v1779_v55, %v1771_v13  ;;  %v898_v2 = vmul.f32 %v1779_v55, %v1775_v61  ;;  %v890_v33 = vmul.f32 %v1779_v55, %v1773_v63  ;;  %v1246_v13 = vld [vmem:[#allocation8] sm:$0xff]  ;;  %v1211_v20 = vpop.permute.xlu0 %1210 }
 0x2ca   :  { %1292 = vmatpush.msra.mxu2 %v1246_v13 }
 0x2cb   :  { %1645 = vmatmul.msk.f32.gmra.mxu0 %vm900_vm2, %v874_v10  ;;  %1653 = vmatmul.msk.f32.gmra.mxu1 %vm900_vm2, %v882_v59 }
 0x2cc   :  { %1669 = vmatmul.msk.f32.gmra.mxu2 %vm900_vm2, %v898_v2 }
 0x2d1   :  { %v1133_v5 = vpop.permute.xlu0 %1132 }
 0x2d3   :  { %1646 = vmatmul.msk.f32.gmra.mxu0 %vm900_vm2, %v2412_v57  ;;  %1654 = vmatmul.msk.f32.gmra.mxu1 %vm900_vm2, %v2414_v19  ;;  %v1167_v19 = vpop.permute.xlu2 %1166 }
 0x2db   :  { %1647 = vmatmul.msk.f32.gmra.mxu0 %vm900_vm2, %v2423_v58  ;;  %1655 = vmatmul.msk.f32.gmra.mxu1 %vm900_vm2, %v2425_v30  ;;  %v2494_v30 = vpop.permute.xlu2 %1206 }
 0x2e3   :  { %1648 = vmatmul.msk.f32.gmra.mxu0 %vm900_vm2, %v2434_v9  ;;  %1656 = vmatmul.msk.f32.gmra.mxu1 %vm900_vm2, %v2436_v41  ;;  %v2500_v41 = vpop.permute.xlu2 %1130 }
 0x2eb   :  { %1649 = vmatmul.msk.f32.gmra.mxu0 %vm900_vm2, %v2446_v25  ;;  %1657 = vmatmul.msk.f32.gmra.mxu1 %vm900_vm2, %v2448_v3  ;;  %v1135_v3 = vpop.permute.xlu2 %1134 }
 0x2f3   :  { %1658 = vmatmul.msk.f32.gmra.mxu1 %vm900_vm2, %v887_v28 }
 0x2fb   :  { %1659 = vmatmul.msk.f32.gmra.mxu1 %vm900_vm2, %v888_v43 }
 0x303   :  { %1660 = vmatmul.msk.f32.gmra.mxu1 %vm900_vm2, %v889_v8  ;;  %v1352_v8 = vld [vmem:[#allocation8 + $0x40] sm:$0xff] }
 0x304   :  { %1372 = vmatpush.msrb.mxu0 %v1352_v8 }
 0x30b   :  { %1661 = vmatmul.msk.f32.gmra.mxu1 %vm900_vm2, %v890_v33 }
 0x310   :  { %v1014_v57 = vpop.f32.mrf.mxu0 }
 0x311   :  { %v1110_v42 = vmul.f32 %v1014_v57, %v2109_v49 }
 0x313   :  { %1662 = vmatmul.msk.f32.gmra.mxu1 %vm900_vm2, %v2417_v12 }
 0x318   :  { %v1017_v58 = vpop.f32.mrf.mxu0 }
 0x319   :  { %v1111_v50 = vmul.f32 %v1017_v58, %v2134_v7  ;;  %v1326_v58 = vld [vmem:[#allocation8 + $0x38] sm:$0xff] }
 0x31b   :  { %1663 = vmatmul.msk.f32.gmra.mxu1 %vm900_vm2, %v2428_v54 }
 0x320   :  { %v2496_v9 = vpop.f32.mrf.mxu0 }
 0x323   :  { %1664 = vmatmul.msk.f32.gmra.mxu1 %vm900_vm2, %v2439_v60 }
 0x328   :  { %v2502_v25 = vpop.f32.mrf.mxu0 }
 0x32b   :  { %1665 = vmatmul.msk.f32.gmra.mxu1 %vm900_vm2, %v2451_v17 }
 0x330   :  { %v1026_v12 = vpop.f32.mrf.mxu0  ;;  %v1050_v23 = vpop.f32.mrf.mxu1 }
 0x331   :  { %v1114_v11 = vmul.f32 %v1026_v12, %v2207_v26  ;;  %v1154_v54 = vmul.f32 %v1135_v3, %v1050_v23  ;;  %v1127_v26 = vpop.permute.xlu1 %1126  ;;  %v1137_v12 = vpop.permute.xlu2 %1136 }
 0x332   :  { %v1213_v23 = vpop.permute.xlu0 %1212 }
 0x333   :  { %v2507_v56 = vadd.f32 %v1154_v54, %v1114_v11  ;;  %1666 = vmatmul.msk.f32.gmra.mxu1 %vm900_vm2, %v2459_v37  ;;  %v1112_v11 = vmul.f32 %v2496_v9, %v2159_v29 }
 0x338   :  { %v2511_v60 = vpop.f32.mrf.mxu0  ;;  %v2513_v18 = vpop.f32.mrf.mxu1 }
 0x339   :  { %v1209_v47 = vpop.permute.xlu1 %1208  ;;  %v1155_v13 = vmul.f32 %v1137_v12, %v2513_v18 }
 0x33a   :  { %v1215_v40 = vpop.permute.xlu0 %1214 }
 0x340   :  { %v2515_v22 = vpop.f32.mrf.mxu0  ;;  %v2517_v17 = vpop.f32.mrf.mxu1 }
 0x341   :  { %v1171_v35 = vpop.permute.xlu1 %1170 }
 0x348   :  { %v2519_v14 = vpop.f32.mrf.mxu0  ;;  %v2521_v21 = vpop.f32.mrf.mxu1 }
 0x349   :  { %v1173_v48 = vpop.permute.xlu1 %1172 }
 0x350   :  { %v1038_v45 = vpop.f32.mrf.mxu0  ;;  %v1062_v28 = vpop.f32.mrf.mxu1 }
 0x351   :  { %v1150_v24 = vmul.f32 %v1127_v26, %v1038_v45  ;;  %v1190_v31 = vmul.f32 %v1167_v19, %v1062_v28  ;;  %v2537_v59 = vpop.permute.xlu1 %1174  ;;  %v2546_v26 = vld [vmem:[%s2629_s11] ss:$0 sm:$0xff]  ;;  %s1920_s11 = smov 64  }
 0x352   :  { %1466 = vrot.lane.b32.xlu0 %v2546_v26, %s1917_s0  ;;  %1476 = vrot.lane.b32.xlu1 %v2546_v26, %s1918_s7 }
 0x353   :  { %v1158_v39 = vadd.f32 %v1150_v24, %v1110_v42  ;;  %1486 = vrot.lane.b32.xlu2 %v2546_v26, %s1919_s23 }
 0x355   :  { %v2524_v32 = vadd.f32 %v1190_v31, %v1158_v39  ;;  %v1101_v31 = vpop.f32.mrf.mxu2 }
 0x358   :  { %v1065_v37 = vpop.f32.mrf.mxu1  ;;  %v1041_v61 = vpop.f32.mrf.mxu0 }
 0x359   :  { %v1151_v1 = vmul.f32 %v1129_v36, %v1041_v61  ;;  %v1191_v2 = vmul.f32 %v1169_v34, %v1065_v37  ;;  %v1177_v29 = vpop.permute.xlu1 %1176  ;;  %v1139_v36 = vpop.permute.xlu2 %1138  ;;  %v1379_v34 = vld [vmem:[#allocation8 + $0x50] sm:$0xff] }
 0x35a   :  { %1496 = vrot.lane.b32.xlu0 %v2546_v26, %s1920_s11  ;;  %1506 = vrot.lane.b32.xlu1 %v2546_v26, %s1916_s8 }
 0x35b   :  { %v1159_v10 = vadd.f32 %v1151_v1, %v1111_v50  ;;  %1516 = vrot.lane.b32.xlu2 %v2546_v26, %s1914_s3 }
 0x35d   :  { %v1199_v57 = vadd.f32 %v1191_v2, %v1159_v10 }
 0x360   :  { %v1068_v16 = vpop.f32.mrf.mxu1  ;;  %v1044_v55 = vpop.f32.mrf.mxu0 }
 0x361   :  { %v1152_v19 = vmul.f32 %v2500_v41, %v1044_v55  ;;  %v1192_v41 = vmul.f32 %v1171_v35, %v1068_v16  ;;  %v1156_v55 = vmul.f32 %v1139_v36, %v2517_v17 }
 0x362   :  { %1526 = vrot.lane.b32.xlu0 %v2546_v26, %s1915_s6 }
 0x363   :  { %v1160_v54 = vadd.f32 %v1152_v19, %v1112_v11 }
 0x365   :  { %v1200_v42 = vadd.f32 %v1192_v41, %v1160_v54 }
 0x368   :  { %v2526_v0 = vpop.f32.mrf.mxu1  ;;  %v1047_v45 = vpop.f32.mrf.mxu0 }
 0x369   :  { %v1153_v24 = vmul.f32 %v1133_v5, %v1047_v45  ;;  %v1193_v35 = vmul.f32 %v1173_v48, %v2526_v0  ;;  %v1434_v5 = vld [vmem:[#allocation8 + $0x78] sm:$0xff] }
 0x370   :  { %v2528_v27 = vpop.f32.mrf.mxu1 }
 0x371   :  { %v1194_v50 = vmul.f32 %v2537_v59, %v2528_v27  ;;  %v1117_v27 = vmul.f32 %v2519_v14, %v2279_v15 }
 0x373   :  { %v1202_v2 = vadd.f32 %v1194_v50, %v2507_v56 }
 0x378   :  { %v2530_v49 = vpop.f32.mrf.mxu1 }
 0x379   :  { %v1195_v0 = vmul.f32 %v1177_v29, %v2530_v49  ;;  %v1116_v49 = vmul.f32 %v2515_v22, %v2257_v38 }
 0x37b   :  { %v1164_v38 = vadd.f32 %v1156_v55, %v1116_v49 }
 0x380   :  { %v2532_v43 = vpop.f32.mrf.mxu1 }
 0x388   :  { %v2534_v63 = vpop.f32.mrf.mxu1 }
 0x390   :  { %v1086_v52 = vpop.f32.mrf.mxu1 }
 0x391   :  { %v1230_v28 = vmul.f32 %v2494_v30, %v1086_v52  ;;  %v1113_v30 = vmul.f32 %v2502_v25, %v2184_v62  ;;  %v1181_v62 = vpop.permute.xlu1 %1180  ;;  %v1104_v52 = vpop.f32.mrf.mxu2 }
 0x392   :  { %v1197_v12 = vmul.f32 %v1181_v62, %v2534_v63 }
 0x393   :  { %v1238_v37 = vadd.f32 %v1230_v28, %v2524_v32  ;;  %v1115_v32 = vmul.f32 %v2511_v60, %v2232_v4  ;;  %v1141_v4 = vpop.permute.xlu2 %1140  ;;  %v1217_v60 = vpop.permute.xlu0 %1216 }
 0x394   :  { %v1235_v8 = vmul.f32 %v1217_v60, %v1101_v31  ;;  %v1157_v59 = vmul.f32 %v1141_v4, %v2521_v21 }
 0x395   :  { %v1163_v1 = vadd.f32 %v1155_v13, %v1115_v32 }
 0x396   :  { %v1165_v22 = vadd.f32 %v1157_v59, %v1117_v27 }
 0x397   :  { %v1203_v18 = vadd.f32 %v1195_v0, %v1163_v1 }
 0x398   :  { %v1089_v33 = vpop.f32.mrf.mxu1  ;;  %v1205_v14 = vadd.f32 %v1197_v12, %v1165_v22 }
 0x399   :  { %v1231_v3 = vmul.f32 %v1209_v47, %v1089_v33  ;;  %v1161_v47 = vadd.f32 %v1153_v24, %v1113_v30  ;;  %v1243_v19 = vadd.f32 %v1235_v8, %v1203_v18  ;;  %v1107_v17 = vpop.f32.mrf.mxu2 }
 0x39b   :  { %v1239_v7 = vadd.f32 %v1231_v3, %v1199_v57  ;;  %v1179_v57 = vpop.permute.xlu1 %1178  ;;  %v1219_v21 = vpop.permute.xlu2 %1218 }
 0x39c   :  { %v1196_v3 = vmul.f32 %v1179_v57, %v2532_v43  ;;  %v1221_v11 = vpop.permute.xlu0 %1220  ;;  %v1236_v56 = vmul.f32 %v1219_v21, %v1104_v52 }
 0x39d   :  { %1670 = vmatmul.msk.f32.vlgmr.msrb.gmra.mxu2 %vm189_vm1, %v1239_v7  ;;  %v1237_v7 = vmul.f32 %v1221_v11, %v1107_v17 }
 0x39e   :  { %1344 = vmatpush.msrb.mxu2 %v1326_v58  ;;  %v1204_v15 = vadd.f32 %v1196_v3, %v1164_v38 }
 0x39f   :  { %v1245_v54 = vadd.f32 %v1237_v7, %v1205_v14 }
 0x3a0   :  { %v1092_v9 = vpop.f32.mrf.mxu1  ;;  %1345 = vmatpush.msrb.mxu2 %v1325_v6  ;;  %v1244_v58 = vadd.f32 %v1236_v56, %v1204_v15 }
 0x3a1   :  { %v1232_v39 = vmul.f32 %v1211_v20, %v1092_v9  ;;  %v1201_v20 = vadd.f32 %v1193_v35, %v1161_v47 }
 0x3a3   :  { %v1240_v16 = vadd.f32 %v1232_v39, %v1200_v42 }
 0x3a5   :  { %1671 = vmatmul.msk.f32.vlgmr.msra.gmra.mxu2 %vm189_vm1, %v1238_v37  ;;  %1672 = vmatmul.msk.f32.vlgmr.msra.gmra.mxu0 %vm189_vm1, %v1240_v16 }
 0x3a6   :  { %1398 = vmatpush.msra.mxu2 %v1380_v53  ;;  %1425 = vmatpush.msra.mxu0 %v1407_v51 }
 0x3a8   :  { %v1095_v25 = vpop.f32.mrf.mxu1  ;;  %1399 = vmatpush.msra.mxu2 %v1379_v34  ;;  %1426 = vmatpush.msra.mxu0 %v1406_v46 }
 0x3a9   :  { %v1233_v61 = vmul.f32 %v1213_v23, %v1095_v25 }
 0x3ab   :  { %v1241_v48 = vadd.f32 %v1233_v61, %v1201_v20 }
 0x3ad   :  { %1673 = vmatmul.msk.f32.vlgmr.msrb.gmra.mxu2 %vm189_vm1, %v1241_v48  ;;  %v1487_v16 = vpop.permute.xlu2 %1486 }
 0x3ae   :  { %1452 = vmatpush.msrb.mxu2 %v1434_v5 }
 0x3b0   :  { %v1098_v10 = vpop.f32.mrf.mxu1  ;;  %1453 = vmatpush.msrb.mxu2 %v1433_v44 }
 0x3b1   :  { %v1234_v33 = vmul.f32 %v1215_v40, %v1098_v10 }
 0x3b3   :  { %v1242_v23 = vadd.f32 %v1234_v33, %v1202_v2 }
 0x3b5   :  { %1674 = vmatmul.msk.f32.vlgmr.msrb.gmra.mxu0 %vm189_vm1, %v1242_v23  ;;  %1675 = vmatmul.msk.f32.vlgmr.msra.gmra.mxu2 %vm189_vm1, %v1243_v19  ;;  %v1517_v25 = vpop.permute.xlu2 %1516 }
 0x3bd   :  { %1676 = vmatmul.msk.f32.vlgmr.msra.gmra.mxu0 %vm189_vm1, %v1244_v58  ;;  %1677 = vmatmul.msk.f32.vlgmr.msrb.gmra.mxu2 %vm189_vm1, %v1245_v54 }
 0x3c4   :  { %v1467_v30 = vpop.permute.xlu0 %1466  ;;  %v1477_v37 = vpop.permute.xlu1 %1476 }
 0x3cc   :  { %v1497_v35 = vpop.permute.xlu0 %1496  ;;  %v1507_v62 = vpop.permute.xlu1 %1506 }
 0x3d4   :  { %v1527_v20 = vpop.permute.xlu0 %1526 }
 0x420   :  { %v1271_v43 = vpop.f32.mrf.mxu2 }
 0x422   :  { %v1320_v6 = vpop.f32.mrf.mxu0 }
 0x428   :  { %v1294_v63 = vpop.f32.mrf.mxu2 }
 0x429   :  { %v1295_v45 = vadd.f32 %v1294_v63, %v1271_v43 }
 0x42b   :  { %v1323_v29 = vadd.f32 %v1320_v6, %v1295_v45 }
 0x430   :  { %v1347_v41 = vpop.f32.mrf.mxu2 }
 0x431   :  { %v1350_v9 = vadd.f32 %v1347_v41, %v1323_v29 }
 0x432   :  { %v1374_v28 = vpop.f32.mrf.mxu0 }
 0x433   :  { %v1377_v24 = vadd.f32 %v1374_v28, %v1350_v9 }
 0x438   :  { %v1401_v42 = vpop.f32.mrf.mxu2 }
 0x439   :  { %v1404_v39 = vadd.f32 %v1401_v42, %v1377_v24 }
 0x43a   :  { %v1428_v31 = vpop.f32.mrf.mxu0 }
 0x43b   :  { %v1431_v53 = vadd.f32 %v1428_v31, %v1404_v39 }
 0x440   :  { %v1455_v51 = vpop.f32.mrf.mxu2 }
 0x441   :  { %v1458_v36 = vadd.f32 %v1455_v51, %v1431_v53 }
 0x443   :  { %v1463_v40 = vadd.f32 %v2546_v26, %v1458_v36  ;;  %v1489_v47 = vadd.f32 %v1487_v16, %v1458_v36  ;;  %v1479_v34 = vadd.f32 %v1477_v37, %v1458_v36  ;;  %v1469_v46 = vadd.f32 %v1467_v30, %v1458_v36 }
 0x444   :  { %v1509_v32 = vadd.f32 %v1507_v62, %v1458_v36  ;;  %v1519_v13 = vadd.f32 %v1517_v25, %v1458_v36  ;;  %v1499_v26 = vadd.f32 %v1497_v35, %v1458_v36  ;;  %v1529_v61 = vadd.f32 %v1527_v20, %v1458_v36 }
 0x445   :  { %1465 = vst.msk [vmem:[#allocation10] sm:$0xf] %vm1464_vm3, %v1463_v40  ;;  %1491 = vrot.lane.b32.xlu0 %v1489_v47, %s1916_s8  ;;  %1481 = vrot.lane.b32.xlu2 %v1479_v34, %s1914_s3 }
 0x446   :  { %1538 = vst.msk [vmem:[#allocation10 + $0x1c] sm:$0xf0] %vm1537_vm4, %v1463_v40  ;;  %1471 = vrot.lane.b32.xlu1 %v1469_v46, %s1915_s6 }
 0x44d   :  { %1521 = vrot.lane.b32.xlu0 %v1519_v13, %s1918_s7  ;;  %1511 = vrot.lane.b32.xlu2 %v1509_v32, %s1919_s23 }
 0x44e   :  { %1501 = vrot.lane.b32.xlu1 %v1499_v26, %s1920_s11 }
 0x456   :  { %1531 = vrot.lane.b32.xlu1 %v1529_v61, %s1917_s0 }
 0x49f   :  { %v1482_v0 = vpop.permute.xlu2 %1481 }
 0x4a0   :  { %1485 = vst.msk [vmem:[#allocation10 + $0x8] sm:$0xf] %vm1464_vm3, %v1482_v0 }
 0x4a1   :  { %1542 = vst.msk [vmem:[#allocation10 + $0x24] sm:$0xf0] %vm1537_vm4, %v1482_v0 }
 0x4a7   :  { %v1512_v48 = vpop.permute.xlu2 %1511 }
 0x4a8   :  { %1515 = vst.msk [vmem:[#allocation10 + $0x14] sm:$0xf] %vm1464_vm3, %v1512_v48 }
 0x4a9   :  { %1548 = vst.msk [vmem:[#allocation10 + $0x30] sm:$0xf0] %vm1537_vm4, %v1512_v48 }
 0x4b7   :  { %v1492_v5 = vpop.permute.xlu0 %1491 }
 0x4b8   :  { %1495 = vst.msk [vmem:[#allocation10 + $0xc] sm:$0xf] %vm1464_vm3, %v1492_v5  ;;  %v1472_v52 = vpop.permute.xlu1 %1471 }
 0x4b9   :  { %1544 = vst.msk [vmem:[#allocation10 + $0x28] sm:$0xf0] %vm1537_vm4, %v1492_v5 }
 0x4ba   :  { %1475 = vst.msk [vmem:[#allocation10 + $0x4] sm:$0xf] %vm1464_vm3, %v1472_v52 }
 0x4bb   :  { %1540 = vst.msk [vmem:[#allocation10 + $0x20] sm:$0xf0] %vm1537_vm4, %v1472_v52 }
 0x4bf   :  { %v1522_v1 = vpop.permute.xlu0 %1521 }
 0x4c0   :  { %1525 = vst.msk [vmem:[#allocation10 + $0x18] sm:$0xf] %vm1464_vm3, %v1522_v1  ;;  %v1502_v50 = vpop.permute.xlu1 %1501 }
 0x4c1   :  { %1550 = vst.msk [vmem:[#allocation10 + $0x34] sm:$0xf0] %vm1537_vm4, %v1522_v1 }
 0x4c2   :  { %1505 = vst.msk [vmem:[#allocation10 + $0x10] sm:$0xf] %vm1464_vm3, %v1502_v50 }
 0x4c3   :  { %1546 = vst.msk [vmem:[#allocation10 + $0x2c] sm:$0xf0] %vm1537_vm4, %v1502_v50 }
 0x4c8   :  { %v1532_v44 = vpop.permute.xlu1 %1531 }
 0x4c9   :  { %1535 = vst.msk [vmem:[#allocation10 + $0x1c] sm:$0xf] %vm1464_vm3, %v1532_v44 }
 0x4ca   :  { %1552 = vst.msk [vmem:[#allocation10 + $0x38] sm:$0xf0] %vm1537_vm4, %v1532_v44 }
 0x4cb   :  { %1565 = dma.vmem_to_hbm [thread:$0]  %s1558_s25, 1024, %s1560_s27, [#allocation4], %s1920_s11, %s1920_s11, %s1922_s28  }
 0x4cc   :  { %1906 = dma.done.wait [#allocation4], 1024  }
 0x4cd   :  { %1907 = vsyncadd [#allocation4], 4294966272 }
 0x4ce   :  { %1570 = vsyncpa [#allocation3], 1 }
 0x4cf   :  { %1571 = vsyncpa [#allocation6], 1 }
 0x4d0   :  { %1572 = vsyncpa [#allocation9], 1 }
 0x4d1   :  { %1573 = vsyncpa [#allocation4], 1 }

</bundles_post_ra>
